<compile_context>
chip_gen: v7x
topology: tpu7x:2x2x1
jax: 0.10.0
libtpu: 0.0.40
codegen_flags: <defaults>
</compile_context>

<pallas_src>
import math
from functools import partial

import jax
import jax.numpy as jnp
import numpy as np
from jax.experimental import pallas as pl
from jax.experimental.pallas import tpu as pltpu


# ----------------------------- helpers / constants ---------------------------

def _round_up(v, m):
    return ((v + m - 1) // m) * m


def _hamming_window(n):
    # torch.hamming_window(n, periodic=True): 0.54 - 0.46*cos(2*pi*k/n)
    k = np.arange(n, dtype=np.float64)
    return 0.54 - 0.46 * np.cos(2.0 * np.pi * k / n)


def _windowed_dft_weights(n_fft, f_pad, k_pad):
    """(2*f_pad, k_pad) bf16: rows [0,F)=win*cos, rows [f_pad,f_pad+F)=-win*sin.
    Columns >= n_fft (hop-decomposition K padding) are zero."""
    n_bins = n_fft // 2 + 1
    n = np.arange(n_fft, dtype=np.float64)[None, :]
    f = np.arange(n_bins, dtype=np.float64)[:, None]
    ang = 2.0 * np.pi * f * n / n_fft
    win = _hamming_window(n_fft)[None, :]
    w = np.zeros((2 * f_pad, k_pad), dtype=np.float32)
    w[:n_bins, :n_fft] = (win * np.cos(ang)).astype(np.float32)
    w[f_pad:f_pad + n_bins, :n_fft] = (-win * np.sin(ang)).astype(np.float32)
    return jnp.asarray(w, dtype=jnp.bfloat16)


# --------------------------------- kernels -----------------------------------

def _crest_rows(spectr, n_bins):
    # spectr: (rows, Tt); pad rows (if any) are zero.  Frequency on sublanes ->
    # max/sum are sublane reductions, crest is a lane-dense row.
    mx = jnp.max(spectr, axis=0, keepdims=True)                         # (1, Tt)
    mean = jnp.sum(spectr, axis=0, keepdims=True) * (1.0 / n_bins) + 1e-20
    # eps keeps zero-padded time columns at crest==0 instead of 0*inf -> NaN.
    return mx * pl.reciprocal(mean, approx=True)                        # EUP, ~free


def _stft_crest_kernel(w_ref, sig_ref, out_ref, *, n_bins, f_pad, t_tile,
                       n_blocks, spectrum_type):
    # sig_ref block: (1, 1, hop, t_tile + n_blocks - 1) bf16 slab of the
    # chunked signal; frame t (within the tile) is the concatenation of slab
    # columns t, t+1, ..., t+n_blocks-1 (hop samples each).
    slab = sig_ref[0, 0]
    fr = jnp.concatenate([slab[:, j:j + t_tile] for j in range(n_blocks)],
                         axis=0)                       # (n_blocks*hop, Tt) bf16
    # single windowed real-DFT matmul on the MXU, f32 accumulation
    res = jnp.dot(w_ref[...], fr, preferred_element_type=jnp.float32)
    re = res[:f_pad, :]                                # (f_pad, Tt)
    im = res[f_pad:, :]                                # (f_pad, Tt)
    spectr = re * re + im * im                         # power; pad rows == 0
    if spectrum_type == "magnitude":
        # TODO(synk): on v5e the full-tile sqrt may become the binding EUP op;
        # on v6e/v7x it rides the otherwise-idle EUP slot.
        spectr = jnp.sqrt(spectr + 1e-14)
        rows = jax.lax.broadcasted_iota(jnp.int32, spectr.shape, 0)
        spectr = jnp.where(rows < n_bins, spectr, 0.0)  # keep pad rows at 0
    out_ref[0] = _crest_rows(spectr, n_bins)           # lane-dense (1, Tt)


def _crest_kernel(x_ref, out_ref, *, n_bins, spectrum_type):
    re = x_ref[0, 0].astype(jnp.float32)               # (F, Tt), bf16 -> f32
    im = x_ref[1, 0].astype(jnp.float32)
    spectr = re * re + im * im
    if spectrum_type == "magnitude":
        spectr = jnp.sqrt(spectr + 1e-14)
    out_ref[0] = _crest_rows(spectr, n_bins)


# --------------------------------- module ------------------------------------

class SpectralCrest:
    def __init__(self, sample_rate, win_length=25, hop_length=10, n_fft=400,
                 spectrum_type="power"):
        self.sample_rate = sample_rate
        self.spectrum_type = spectrum_type
        self.win_length = int(round(sample_rate * win_length / 1000))
        self.hop_length = int(round(sample_rate * hop_length / 1000))
        self.n_fft = n_fft
        self.n_bins = n_fft // 2 + 1
        self.f_pad = _round_up(self.n_bins, 8)
        # TODO(synk): win_length < n_fft (window zero-padding) not handled; the
        # default speechbrain config (16 kHz, 25 ms, n_fft=400) has them equal.
        assert self.win_length == n_fft, "assumes win_length == n_fft"
        # hop decomposition: a frame = n_blocks consecutive hop-sized chunks
        self.n_blocks = -(-n_fft // self.hop_length)
        self.k_pad = self.n_blocks * self.hop_length
        # windowed cos|sin weights, bf16, (2*f_pad, n_blocks*hop)
        self.dft_weights = _windowed_dft_weights(n_fft, self.f_pad, self.k_pad)

    def __call__(self, x):
        if x.ndim == 2:
            return self._forward_time(x)
        return self._forward_freq(x)

    # ---- chunked-signal layout: (B, n_tiles, hop, t_tile + n_blocks - 1) ----
    def _chunk_signal(self, x):
        B, L = x.shape
        N, hop, nb = self.n_fft, self.hop_length, self.n_blocks
        pad = N // 2                                   # center=True
        # TODO(synk): torch.stft default pad_mode is 'reflect'; zero padding
        # kept to match the bundled numpy reference.
        T = 1 + (L + 2 * pad - N) // hop
        # Large tiles amortize the ~0.35us/grid-step overhead; the cap keeps
        # T_pad-T waste and per-step VMEM small and leaves >= B*n_tiles steps
        # so both v7x TensorCores stay busy on short clips.
        t_tile = min(1024, _round_up(T, 128))
        n_tiles = -(-T // t_tile)
        T_pad = n_tiles * t_tile
        rows = max(T_pad + nb - 1, -(-(L + 2 * pad) // hop))
        total = rows * hop
        xb = x.astype(jnp.bfloat16)                    # all framing prep in bf16
        padded = jnp.pad(xb, ((0, 0), (pad, total - L - pad)))
        chunks = padded.reshape(B, rows, hop)          # row r = samples [r*hop,(r+1)*hop)
        pieces = [chunks[:, :T_pad].reshape(B, n_tiles, t_tile, hop)]
        for e in range(1, nb):                         # per-tile overlap columns
            ex = chunks[:, t_tile + e - 1::t_tile][:, :n_tiles]
            pieces.append(ex[:, :, None, :])
        cat = jnp.concatenate(pieces, axis=2)          # (B, n_tiles, width, hop)
        sig = jnp.swapaxes(cat, 2, 3)                  # (B, n_tiles, hop, width)
        return sig, T, T_pad, t_tile, n_tiles

    # ---- time-domain path: fused in-kernel framing + real-DFT + crest -------
    def _forward_time(self, x):
        sig, T, T_pad, t_tile, n_tiles = self._chunk_signal(x)
        B = x.shape[0]
        hop, nb = self.hop_length, self.n_blocks
        width = t_tile + nb - 1
        kernel = partial(_stft_crest_kernel, n_bins=self.n_bins,
                         f_pad=self.f_pad, t_tile=t_tile, n_blocks=nb,
                         spectrum_type=self.spectrum_type)
        # TODO(synk): the constant-index weight BlockSpec is still
        # double-buffered by the default pipeline (~0.4 MiB extra); a
        # single-buffered spec / one-shot VMEM scratch copy would reclaim it.
        out = pl.pallas_call(
            kernel,
            out_shape=jax.ShapeDtypeStruct((B, 1, T_pad), jnp.float32),
            grid_spec=pltpu.PrefetchScalarGridSpec(
                num_scalar_prefetch=0,
                grid=(B, n_tiles),
                in_specs=[
                    pl.BlockSpec((2 * self.f_pad, self.k_pad),
                                 lambda b, t: (0, 0)),
                    pl.BlockSpec((1, 1, hop, width), lambda b, t: (b, t, 0, 0)),
                ],
                out_specs=pl.BlockSpec((1, 1, t_tile), lambda b, t: (b, 0, t)),
            ),
            compiler_params=pltpu.CompilerParams(
                dimension_semantics=("parallel", "parallel"),
                vmem_limit_bytes=32 * 1024 * 1024),
        )(self.dft_weights, sig)
        return out[:, 0, :T, None]                     # (B, T, 1)

    # ---- frequency-domain path: x is (B, T, F, 2) ----------------------------
    def _forward_freq(self, x):
        B, T, F, _ = x.shape
        t_tile = min(2048, _round_up(T, 128))
        n_tiles = -(-T // t_tile)
        T_pad = n_tiles * t_tile
        # one lane-dense bf16 stream (2, B, F, T): halves transpose + kernel DMA
        xt = jnp.transpose(x, (3, 0, 2, 1)).astype(jnp.bfloat16)
        if T_pad != T:
            xt = jnp.pad(xt, ((0, 0), (0, 0), (0, 0), (0, T_pad - T)))
        kernel = partial(_crest_kernel, n_bins=F,
                         spectrum_type=self.spectrum_type)
        out = pl.pallas_call(
            kernel,
            out_shape=jax.ShapeDtypeStruct((B, 1, T_pad), jnp.float32),
            grid_spec=pltpu.PrefetchScalarGridSpec(
                num_scalar_prefetch=0,
                grid=(B, n_tiles),
                in_specs=[
                    pl.BlockSpec((2, 1, F, t_tile), lambda b, t: (0, b, 0, t)),
                ],
                out_specs=pl.BlockSpec((1, 1, t_tile), lambda b, t: (b, 0, t)),
            ),
            compiler_params=pltpu.CompilerParams(
                dimension_semantics=("parallel", "parallel"),
                vmem_limit_bytes=32 * 1024 * 1024),
        )(xt)
        return out[:, 0, :T, None]                     # (B, T, 1)


# ------------------------------ numpy reference -------------------------------

def _reference(x, mod):
    x = np.asarray(x, dtype=np.float64)
    B, L = x.shape
    N, hop = mod.n_fft, mod.hop_length
    pad = N // 2
    padded = np.pad(x, ((0, 0), (pad, pad)))
    T = 1 + (L + 2 * pad - N) // hop
    idx = np.arange(T)[:, None] * hop + np.arange(N)[None, :]
    win = _hamming_window(N)
    frames = padded[:, idx] * win[None, None, :]
    n = np.arange(N, dtype=np.float64)[:, None]
    f = np.arange(N // 2 + 1, dtype=np.float64)[None, :]
    ang = 2.0 * np.pi * n * f / N
    re = frames @ np.cos(ang)
    im = frames @ (-np.sin(ang))
    spectr = re * re + im * im
    if mod.spectrum_type == "magnitude":
        spectr = np.sqrt(spectr + 1e-14)
    crest = spectr.max(-1, keepdims=True) / spectr.mean(-1, keepdims=True)
    stft4 = np.stack([re, im], axis=-1).astype(np.float32)
    return crest.astype(np.float32), jnp.asarray(stft4)


# ------------------------------------ main ------------------------------------

if __name__ == "__main__":
    key = jax.random.PRNGKey(0)
    sample_rate = 16000
    # small input: 2 signals of 1600 samples -> 11 frames, 201 freq bins
    x = jax.random.normal(key, (2, 1600), dtype=jnp.float32)

    mod = SpectralCrest(sample_rate=sample_rate)

    # time-domain path (in-kernel framing + windowed real-DFT matmul + crest)
    out_time = jax.block_until_ready(mod(x))
    assert out_time.shape == (2, 11, 1), out_time.shape

    ref_crest, stft4 = _reference(x, mod)
    np.testing.assert_allclose(np.asarray(out_time), ref_crest,
                               rtol=3e-2, atol=1e-2)   # bf16 MXU path

    # frequency-domain path ((B, T, F, 2) input, crest-only kernel, bf16 DMA)
    out_freq = jax.block_until_ready(mod(stft4))
    assert out_freq.shape == (2, 11, 1), out_freq.shape
    np.testing.assert_allclose(np.asarray(out_freq), ref_crest,
                               rtol=2.5e-2, atol=1e-2)  # bf16 re/im storage

    print("KERNEL_OK")
</pallas_src>

<mosaic_0001>
module attributes {stable_mosaic.version = 11 : i64} {
  func.func @_stft_crest_kernel(%arg0: i32, %arg1: i32, %arg2: memref<416x480xbf16, #tpu.memory_space<vmem>>, %arg3: memref<1x1x160x130xbf16, #tpu.memory_space<vmem>>, %arg4: memref<1x1x128xf32, #tpu.memory_space<vmem>>) attributes {dimension_semantics = [#tpu.dimension_semantics<parallel>, #tpu.dimension_semantics<parallel>], iteration_bounds = array<i64: 2, 1>, scalar_prefetch = 0 : i64, scratch_operands = 0 : i64, tpu.core_type = #tpu.core_type<tc>, window_params = [{pipeline_mode = #tpu.pipeline_mode<synchronous>, transform_indices = @transform_0, window_bounds = array<i64: 416, 480>}, {transform_indices = @transform_1, window_bounds = array<i64: 1, 1, 160, 130>}, {transform_indices = @transform_2, window_bounds = array<i64: 1, 1, 128>}]} {
    %c0 = arith.constant 0 : index
    %c0_0 = arith.constant 0 : index
    %c0_1 = arith.constant 0 : index
    %c0_2 = arith.constant 0 : index
    %0 = vector.load %arg3[%c0, %c0_0, %c0_1, %c0_2] : memref<1x1x160x130xbf16, #tpu.memory_space<vmem>>, vector<1x1x160x130xbf16>
    %1 = vector.shape_cast %0 : vector<1x1x160x130xbf16> to vector<160x130xbf16>
    %2 = vector.extract_strided_slice %1 {offsets = [0, 0], sizes = [160, 128], strides = [1, 1]} : vector<160x130xbf16> to vector<160x128xbf16>
    %3 = vector.extract_strided_slice %1 {offsets = [0, 1], sizes = [160, 128], strides = [1, 1]} : vector<160x130xbf16> to vector<160x128xbf16>
    %4 = vector.extract_strided_slice %1 {offsets = [0, 2], sizes = [160, 128], strides = [1, 1]} : vector<160x130xbf16> to vector<160x128xbf16>
    %5 = tpu.concatenate %2, %3, %4 in 0 : vector<160x128xbf16>, vector<160x128xbf16>, vector<160x128xbf16> -> vector<480x128xbf16>
    %c0_3 = arith.constant 0 : index
    %c0_4 = arith.constant 0 : index
    %6 = vector.load %arg2[%c0_3, %c0_4] : memref<416x480xbf16, #tpu.memory_space<vmem>>, vector<416x480xbf16>
    %cst = arith.constant dense<0.000000e+00> : vector<416x128xf32>
    %7 = tpu.matmul %6, %5, %cst {dimension_numbers = #tpu.dot_dimension_numbers<[1], [0], [0], [1], [0, 0, 1, 1], [], []>} : vector<416x480xbf16>, vector<480x128xbf16>, vector<416x128xf32> -> vector<416x128xf32>
    %8 = vector.extract_strided_slice %7 {offsets = [0, 0], sizes = [208, 128], strides = [1, 1]} : vector<416x128xf32> to vector<208x128xf32>
    %9 = vector.extract_strided_slice %7 {offsets = [208, 0], sizes = [208, 128], strides = [1, 1]} : vector<416x128xf32> to vector<208x128xf32>
    %10 = arith.mulf %8, %8 : vector<208x128xf32>
    %11 = arith.mulf %9, %9 : vector<208x128xf32>
    %12 = arith.addf %10, %11 : vector<208x128xf32>
    %cst_5 = arith.constant dense<0xFF800000> : vector<128xf32>
    %13 = vector.multi_reduction <maximumf>, %12, %cst_5 [0] : vector<208x128xf32> to vector<128xf32>
    %14 = vector.shape_cast %13 : vector<128xf32> to vector<1x128xf32>
    %cst_6 = arith.constant dense<0.000000e+00> : vector<128xf32>
    %15 = vector.multi_reduction <add>, %12, %cst_6 [0] : vector<208x128xf32> to vector<128xf32>
    %16 = vector.shape_cast %15 : vector<128xf32> to vector<1x128xf32>
    %cst_7 = arith.constant 0.00497512426 : f32
    %17 = vector.broadcast %cst_7 : f32 to vector<1x128xf32>
    %18 = arith.mulf %16, %17 : vector<1x128xf32>
    %cst_8 = arith.constant 9.99999968E-21 : f32
    %19 = vector.broadcast %cst_8 : f32 to vector<1x128xf32>
    %20 = arith.addf %18, %19 : vector<1x128xf32>
    %21 = tpu.reciprocal %20 {approx = true} : vector<1x128xf32> -> vector<1x128xf32>
    %22 = arith.mulf %14, %21 : vector<1x128xf32>
    %c0_9 = arith.constant 0 : index
    %c0_10 = arith.constant 0 : index
    %c0_11 = arith.constant 0 : index
    %23 = vector.load %arg4[%c0_9, %c0_10, %c0_11] : memref<1x1x128xf32, #tpu.memory_space<vmem>>, vector<1x1x128xf32>
    %24 = vector.shape_cast %23 : vector<1x1x128xf32> to vector<1x128xf32>
    %25 = vector.shape_cast %22 : vector<1x128xf32> to vector<1x1x128xf32>
    tpu.vector_store %arg4[%c0_9, %c0_10, %c0_11], %25 {strides = array<i32>} : memref<1x1x128xf32, #tpu.memory_space<vmem>>, vector<1x1x128xf32>,
    return
  }
  func.func @transform_0(%arg0: i32, %arg1: i32) -> (i32, i32) {
    %c0_i32 = arith.constant 0 : i32
    %c0_i32_0 = arith.constant 0 : i32
    %c0_i32_1 = arith.constant 0 : i32
    return %c0_i32, %c0_i32_0 : i32, i32
  }
  func.func @transform_1(%arg0: i32, %arg1: i32) -> (i32, i32, i32, i32) {
    %c0_i32 = arith.constant 0 : i32
    %c0_i32_0 = arith.constant 0 : i32
    %c0_i32_1 = arith.constant 0 : i32
    return %arg0, %arg1, %c0_i32, %c0_i32_0 : i32, i32, i32, i32
  }
  func.func @transform_2(%arg0: i32, %arg1: i32) -> (i32, i32, i32) {
    %c0_i32 = arith.constant 0 : i32
    %c0_i32_0 = arith.constant 0 : i32
    return %arg0, %c0_i32, %arg1 : i32, i32, i32
  }
}

</mosaic_0001>

<bundles_post_ra>
// kernel: tpu_custom_call.1
= control target key start
LH: loop header
LB: loop body
LE: loop exit
PB: predicated region body
PF: predicated region fallthrough
CT: control target
= control target key end

     0   :  { %7 = vsyncpa [#allocation3], 0  ;;  %s2885_s0 = inlined_call_operand.hbm [shape: bf16[416,480], index: 0, kind: input, shape index: {}]   ;;  %s2886_s1 = inlined_call_operand.vmem [shape: bf16[2,1,160,130], index: 1, kind: input, shape index: {}]   ;;  %s2887_s2 = inlined_call_operand.hbm [shape: f32[2,1,128], index: 2, kind: output, shape index: {}]  }
   0x1   :  { %8 = vsyncpa [#allocation4], 0 }
   0x2   :  { %10 = vsyncpa [#allocation4 + $0x1], 0  ;;  %s2427_s9 = smov 0   ;;  %s2429_s10 = smov 0  }
   0x3   :  { %s2431_s11 = smov 0   ;;  %s2433_s12 = smov 0  }
   0x4   :  { %s2435_s13 = smov 0   ;;  %s2437_s14 = smov 0  }
   0x5 LB: > { %s1820_s15 = sadd.s32 4294967295, %s2403_s14   ;;  %s1821_s16 = sadd.s32 4294967294, %s2403_s14   ;;  %s2403_s14 = sphi %s2437_s14, %s16_s14   ;;  %s2399_s13 = sphi %s2435_s13, %s2905_s13   ;;  %s2395_s12 = sphi %s2433_s12, %s2904_s12   ;;  %s2391_s11 = sphi %s2431_s11, %s2903_s11   ;;  %s2387_s10 = sphi %s2429_s10, %s2902_s10   ;;  %s2383_s9 = sphi %s2427_s9, %s2901_s9  }
   0x6   : > { %s28_s17 = sadd.s32 1, %s2399_s13  ;;  %s86_s18 = sadd.s32 1, %s2391_s11 }
   0x7   : > { %p30_p0 = scmp.ge.s32.totalorder %s28_s17, 2  ;;  %p96_p1 = scmp.ne.s32.totalorder %s2391_s11, %s2387_s10 }
   0x8   : > { %p97_p2 = scmp.eq.s32.totalorder %s1820_s15, 1  ;;  %p102_p3 = scmp.ne.s32.totalorder %s2387_s10, %s2383_s9 }
   0x9   : > { %s2907_s17 = smov (%p30_p0, %s28_s17), 0  ;;  %p103_p5 = scmp.eq.s32.totalorder %s1821_s16, 1 }
   0xa   : > { %p2467_p4 = por %p97_p2, %p96_p1  ;;  %s81_s20 = ssub.s32 %s2399_s13, %s2907_s17 }
   0xb   : > { %p1822_p6 = scmp.ge.s32.totalorder %s2403_s14, 1  ;;  %p84_p7 = scmp.eq.s32.totalorder %s81_s20, 0 }
   0xc   : > { %s2892_s19 = scalar_select %p2467_p4, 1, 0 }
   0xd   : > { %p2474_p8 = por %p103_p5, %p102_p3  ;;  %p110_p9 = scmp.lt.s32.totalorder %s2403_s14, 3 }
   0xe   : > { %s2480_s22 = scalar_select %p84_p7, %s2391_s11, %s86_s18  }
   0xf   : > { %s2893_s21 = scalar_select %p2474_p8, 1, 0 }
  0x10   : > { %p2482_p10 = pnand %p1822_p6, %p110_p9  ;;  %p2486_p11 = scmp.eq.s32.totalorder %s1820_s15, 0 }
  0x11   : > { %s2405_s25 = smov [#allocation2]   ;;  %s2293_s30 = scalar_lea.hbm %s2885_s0, 13312 }
  0x12   : > { %s2894_s23 = scalar_select %p2482_p10, 1, 0 }
  0x13   : > { %s2895_s24 = scalar_select %p2486_p11, 1, 0 }
  0x14   : > { %p2040_p12 = pneg %p2482_p10  ;;  %s122_s26 = sshll.u32 %s2405_s25, 4  ;;  %s123_s26 = int_to_ptr.vmem [resolvable:$true] %s122_s26 }
  0x15   : > { %p2294_p0 = scmp.ne.s32.totalorder %s2885_s0, %s2293_s30  ;;  %p2300_p5 = scmp.lt.u32.totalorder %s2293_s30, %s2885_s0 }
  0x16   : > { %p2494_p13 = pnand %p2486_p11, %p2040_p12 }
  0x18   : > { %p2295_p1 = pneg %p2494_p13 }
  0x1a   : > { %p2296_p2 = pnand %p2295_p1, %p2294_p0 }
  0x1c   : > { %p2297_p3 = pneg %p2296_p2 }
  0x1e   : > { %p2302_p6 = pnand %p2300_p5, %p2297_p3 }
  0x20   : > { %2305 = shalt.err (!%p2302_p6)
}
  0x21   : > { %s2306_s7 = scalar_lea.vmem %s123_s26, 13312  ;;  %p2314_p8 = scmp.lt.s32.totalorder %s123_s26, %s123_s26 }
  0x22   : > { %p2307_p7 = scmp.ne.s32.totalorder %s123_s26, %s2306_s7  ;;  %p2315_p4 = scmp.lt.s32.totalorder %s2306_s7, %s2306_s7 }
  0x24   : > { %p2309_p9 = pnand %p2307_p7, %p2295_p1  ;;  %p2316_p11 = por %p2315_p4, %p2314_p8 }
  0x26   : > { %p2310_p12 = pneg %p2309_p9 }
  0x28   : > { %p2317_p10 = pnand %p2316_p11, %p2310_p12 }
  0x2a   : > { %2320 = shalt.err (!%p2317_p10)
}
  0x2b   : > { %s2406_s8 = smov 256   ;;  %s2407_s15 = smov 16  }
  0x2c   : > { %2043 = dma.hbm_to_vmem [thread:$0]  (!%p2494_p13), %s2885_s0, 13312, %s123_s26, [#allocation3], %s2406_s8, %s2406_s8, %s2407_s15  }
  0x2d   : > { %p2897_p0 = scmp.ne.s32.totalorder %s2894_s23, 0 }
  0x2e   : > { %p2898_p2 = scmp.ne.s32.totalorder (!%p2897_p0), %s2895_s24, 0 }
  0x2f   : > { %150 = sbr.rel (%p2897_p0) target bundleno = 723 (0x2d3), region = 28 }
  0x36   : > { %2374 = dma.done.wait (%p2898_p2), [#allocation3], 13312  }
  0x37   : > { %2376 = vsyncadd (%p2898_p2), [#allocation3], 4294953984  ;;  %p175_p4 = scmp.lt.s32.totalorder %s2395_s12, 1  ;;  %v2408_v0 = vmov 0   ;;  %s2409_s24 = smov 127   ;;  %vm1015_vm0 = vcmask 785408  }
  0x38   : > { %1094 = vmatprep.subr.bf16.mxu1 %v2408_v0  ;;  %1335 = vmatprep.subr.bf16.mxu0 %v2408_v0  ;;  %s2410_s28 = smov 126   ;;  %v2137_v21 = vld [vmem:[#allocation2 + $0x4] ss:$16 sps:$4 sm:$0xff]   ;;  %v2140_v22 = vld [vmem:[#allocation2 + $0xc] ss:$16 sps:$4 sm:$0xff]   ;;  %vm335_vm1 = vcmask 1039360  }
  0x39   : > { %s176_s20 = scalar_select %p175_p4, %s2395_s12, 1  ;;  %1126 = vmatprep.mubr.bf16.mxu1 %v2137_v21  ;;  %1952 = vmatprep.mubr.msk.bf16.mxu0 %vm1015_vm0, %v2140_v22  ;;  %vm396_vm2 = vcmask 1031168   ;;  %v2138_v22 = vld [vmem:[#allocation2 + $0x8] ss:$16 sps:$4 sm:$0xff]  }
  0x3a   : > { %s173_s29 = sand.u32 1, %s2387_s10   ;;  %s1978_s30 = sshll.u32 %s2395_s12, 4 }
  0x3b   : > { %s2033_s25 = smul.u32 160, %s176_s20  ;;  %s174_s3 = scalar_lea.vmem [#allocation5], %s173_s29 }
  0x3c   : > { %s1735_s4 = sshll.u32 %s174_s3, 4  ;;  %s2838_s7 = scalar_lea.hbm %s2887_s2, %s1978_s30  ;;  %s2840_s4 = int_to_ptr.vmem [resolvable:$true] %s1735_s4 }
  0x3d   : > { %s2527_s23 = scalar_lea.vmem %s2886_s1, %s2033_s25  ;;  %s1722_s8 = scalar_lea.sflag [#allocation4], %s173_s29 }
  0x3e   : > { %v2530_v1 = vld [vmem:[%s2527_s23 + $0x70] ss:$8 sps:$4 sm:$0xff]   ;;  %v2533_v2 = vld [vmem:[%s2527_s23 + $0x60] ss:$8 sps:$4 sm:$0xff]   ;;  %v2538_v3 = vld [vmem:[%s2527_s23 + $0x74] ss:$8 sps:$4 sm:$0xff]  }
  0x3f   : > { %323 = vrot.lane.b32.xlu1 %v2530_v1, %s2409_s24  ;;  %319 = vrot.lane.b32.xlu0 %v2533_v2, %s2409_s24  ;;  %v2110_v4 = vld [vmem:[%s2527_s23 + $0x64] ss:$8 sps:$4 sm:$0xff]   ;;  %v2119_v6 = vld [vmem:[%s2527_s23] ss:$8 sps:$4 sm:$0xff]   ;;  %s2321_s15 = scalar_lea.vmem %s2840_s4, 16  ;;  %p2899_p10 = scmp.ne.s32.totalorder %s2892_s19, 0 }
  0x40   : > { %v2546_v5 = vld [vmem:[%s2527_s23 + $0x84] ss:$8 sps:$4 sm:$0xff]   ;;  %v2551_v7 = vld [vmem:[%s2527_s23 + $0x80] ss:$8 sps:$4 sm:$0xff]   ;;  %1095 = vmatpush1.bf16.msra.mxu1 %v2119_v6  ;;  %v2557_v8 = vld [vmem:[%s2527_s23 + $0x94] ss:$8 sps:$4 sm:$0xff]   ;;  %p2322_p8 = scmp.ne.s32.totalorder %s2840_s4, %s2321_s15 }
  0x41   : > { %1096 = vmatprep.subr.bf16.mxu1 %v2408_v0  ;;  %v2122_v9 = vld [vmem:[%s2527_s23 + $0x10] ss:$8 sps:$4 sm:$0xff]   ;;  %v2117_v11 = vld [vmem:[%s2527_s23 + $0x4] ss:$8 sps:$4 sm:$0xff]   ;;  %v2125_v12 = vld [vmem:[%s2527_s23 + $0x20] ss:$8 sps:$4 sm:$0xff]  }
  0x42   : > { %v2563_v10 = vld [vmem:[%s2527_s23 + $0x90] ss:$8 sps:$4 sm:$0xff]   ;;  %v2120_v13 = vld [vmem:[%s2527_s23 + $0x14] ss:$8 sps:$4 sm:$0xff]   ;;  %v2123_v15 = vld [vmem:[%s2527_s23 + $0x24] ss:$8 sps:$4 sm:$0xff]   ;;  %p2323_p11 = pnand %p2322_p8, %p2899_p10 }
  0x43   : > { %325 = vrot.lane.b32.xlu1 %v2538_v3, %s2409_s24  ;;  %321 = vrot.lane.b32.xlu0 %v2110_v4, %s2409_s24  ;;  %v2128_v14 = vld [vmem:[%s2527_s23 + $0x30] ss:$8 sps:$4 sm:$0xff]   ;;  %v2131_v16 = vld [vmem:[%s2527_s23 + $0x40] ss:$8 sps:$4 sm:$0xff]   ;;  %s2411_s12 = smov [#allocation5]  }
  0x44   : > { %1097 = vmatpush1.bf16.msra.mxu1 %v2122_v9  ;;  %v2126_v17 = vld [vmem:[%s2527_s23 + $0x34] ss:$8 sps:$4 sm:$0xff]   ;;  %v2134_v18 = vld [vmem:[%s2527_s23 + $0x50] ss:$8 sps:$4 sm:$0xff]   ;;  %v2129_v19 = vld [vmem:[%s2527_s23 + $0x44] ss:$8 sps:$4 sm:$0xff]   ;;  %p2324_p13 = pneg %p2323_p11 }
  0x45   : > { %1098 = vmatprep.subr.bf16.mxu1 %v2408_v0  ;;  %v2132_v20 = vld [vmem:[%s2527_s23 + $0x54] ss:$8 sps:$4 sm:$0xff]   ;;  %s2325_s16 = sshll.u32 %s2411_s12, 4  ;;  %s2326_s16 = int_to_ptr.vmem [resolvable:$false] %s2325_s16 }
  0x46   : > { %s2327_s18 = scalar_lea.vmem %s2326_s16, 32  ;;  %p2328_p1 = scmp.lt.s32.totalorder %s2840_s4, %s2326_s16 }
  0x47   : > { %329 = vrot.lane.b32.xlu1 %v2546_v5, %s2409_s24  ;;  %327 = vrot.lane.b32.xlu0 %v2551_v7, %s2409_s24  ;;  %p2329_p3 = scmp.lt.s32.totalorder %s2327_s18, %s2321_s15 }
  0x48   : > { %1099 = vmatpush1.bf16.msra.mxu1 %v2125_v12 }
  0x49   : > { %1100 = vmatprep.subr.bf16.mxu1 %v2408_v0  ;;  %p2330_p5 = por %p2329_p3, %p2328_p1 }
  0x4b   : > { %333 = vrot.lane.b32.xlu1 %v2557_v8, %s2409_s24  ;;  %331 = vrot.lane.b32.xlu0 %v2563_v10, %s2409_s24  ;;  %p2331_p6 = pnand %p2330_p5, %p2324_p13 }
  0x4c   : > { %1101 = vmatpush1.bf16.msra.mxu1 %v2128_v14 }
  0x4d   : > { %1102 = vmatprep.subr.bf16.mxu1 %v2408_v0 }
  0x4f   : > { %358 = vrot.lane.b32.xlu1 %v2117_v11, %s2410_s28  ;;  %356 = vrot.lane.b32.xlu0 %v2119_v6, %s2410_s28 }
  0x50   : > { %1103 = vmatpush1.bf16.msra.mxu1 %v2131_v16 }
  0x51   : > { %1104 = vmatprep.subr.bf16.mxu1 %v2408_v0 }
  0x53   : > { %362 = vrot.lane.b32.xlu1 %v2120_v13, %s2410_s28  ;;  %360 = vrot.lane.b32.xlu0 %v2122_v9, %s2410_s28 }
  0x54   : > { %1105 = vmatpush1.bf16.msra.mxu1 %v2134_v18 }
  0x55   : > { %1106 = vmatprep.subr.bf16.mxu1 %v2408_v0 }
  0x57   : > { %366 = vrot.lane.b32.xlu1 %v2123_v15, %s2410_s28  ;;  %364 = vrot.lane.b32.xlu0 %v2125_v12, %s2410_s28 }
  0x58   : > { %1107 = vmatpush1.bf16.msra.mxu1 %v2533_v2 }
  0x59   : > { %1108 = vmatprep.subr.bf16.mxu1 %v2408_v0 }
  0x5b   : > { %370 = vrot.lane.b32.xlu1 %v2126_v17, %s2410_s28  ;;  %368 = vrot.lane.b32.xlu0 %v2128_v14, %s2410_s28 }
  0x5c   : > { %1109 = vmatpush1.bf16.msra.mxu1 %v2530_v1 }
  0x5d   : > { %1110 = vmatprep.subr.bf16.mxu1 %v2408_v0 }
  0x5f   : > { %297 = vrot.lane.b32.xlu1 %v2117_v11, %s2409_s24  ;;  %295 = vrot.lane.b32.xlu0 %v2119_v6, %s2409_s24 }
  0x60   : > { %1111 = vmatpush1.bf16.msra.mxu1 %v2551_v7 }
  0x61   : > { %1112 = vmatprep.subr.bf16.mxu1 %v2408_v0 }
  0x63   : > { %374 = vrot.lane.b32.xlu1 %v2129_v19, %s2410_s28  ;;  %372 = vrot.lane.b32.xlu0 %v2131_v16, %s2410_s28 }
  0x64   : > { %1113 = vmatpush1.bf16.msra.mxu1 %v2563_v10 }
  0x65   : > { %1114 = vmatprep.subr.bf16.mxu1 %v2408_v0 }
  0x67   : > { %301 = vrot.lane.b32.xlu1 %v2120_v13, %s2409_s24  ;;  %299 = vrot.lane.b32.xlu0 %v2122_v9, %s2409_s24 }
  0x6b   : > { %378 = vrot.lane.b32.xlu1 %v2132_v20, %s2410_s28  ;;  %376 = vrot.lane.b32.xlu0 %v2134_v18, %s2410_s28 }
  0x6f   : > { %305 = vrot.lane.b32.xlu1 %v2123_v15, %s2409_s24  ;;  %303 = vrot.lane.b32.xlu0 %v2125_v12, %s2409_s24 }
  0x73   : > { %382 = vrot.lane.b32.xlu1 %v2110_v4, %s2410_s28  ;;  %380 = vrot.lane.b32.xlu0 %v2533_v2, %s2410_s28 }
  0x77   : > { %309 = vrot.lane.b32.xlu1 %v2126_v17, %s2409_s24  ;;  %307 = vrot.lane.b32.xlu0 %v2128_v14, %s2409_s24  ;;  %v2135_v17 = vld [vmem:[#allocation2] ss:$16 sps:$4 sm:$0xff]  }
  0x7b   : > { %386 = vrot.lane.b32.xlu1 %v2538_v3, %s2410_s28  ;;  %384 = vrot.lane.b32.xlu0 %v2530_v1, %s2410_s28 }
  0x7f   : > { %313 = vrot.lane.b32.xlu1 %v2129_v19, %s2409_s24  ;;  %311 = vrot.lane.b32.xlu0 %v2131_v16, %s2409_s24 }
  0x83   : > { %390 = vrot.lane.b32.xlu1 %v2546_v5, %s2410_s28  ;;  %388 = vrot.lane.b32.xlu0 %v2551_v7, %s2410_s28 }
  0x87   : > { %317 = vrot.lane.b32.xlu1 %v2132_v20, %s2409_s24  ;;  %315 = vrot.lane.b32.xlu0 %v2134_v18, %s2409_s24  ;;  %v2141_v18 = vld [vmem:[#allocation2 + $0x24] ss:$16 sps:$4 sm:$0xff]  }
  0x8b   : > { %394 = vrot.lane.b32.xlu1 %v2557_v8, %s2410_s28  ;;  %392 = vrot.lane.b32.xlu0 %v2563_v10, %s2410_s28 }
  0xb1   : > { %v324_v23 = vpop.permute.xlu1 %323  ;;  %v320_v24 = vpop.permute.xlu0 %319 }
  0xb5   : > { %v326_v25 = vpop.permute.xlu1 %325  ;;  %v322_v26 = vpop.permute.xlu0 %321 }
  0xb6   : > { %v342_v27 = vsel %vm335_vm1, %v320_v24, %v322_v26  ;;  %v343_v30 = vsel %vm335_vm1, %v324_v23, %v326_v25  ;;  %v2144_v23 = vld [vmem:[#allocation2 + $0x2c] ss:$16 sps:$4 sm:$0xff]   ;;  %v2143_v24 = vld [vmem:[#allocation2 + $0x20] ss:$16 sps:$4 sm:$0xff]   ;;  %v2146_v25 = vld [vmem:[#allocation2 + $0x28] ss:$16 sps:$4 sm:$0xff]  }
  0xb7   : > { %1336 = vmatpush1.bf16.msra.mxu0 %v342_v27  ;;  %v2150_v26 = vld [vmem:[#allocation2 + $0x4c] ss:$16 sps:$4 sm:$0xff]   ;;  %v2149_v27 = vld [vmem:[#allocation2 + $0x40] ss:$16 sps:$4 sm:$0xff]  }
  0xb8   : > { %1337 = vmatprep.subr.bf16.mxu0 %v2408_v0 }
  0xb9   : > { %v330_v28 = vpop.permute.xlu1 %329  ;;  %v328_v29 = vpop.permute.xlu0 %327 }
  0xba   : > { %v344_v33 = vsel %vm335_vm1, %v328_v29, %v330_v28  ;;  %v2153_v28 = vld [vmem:[#allocation2 + $0x64] ss:$16 sps:$4 sm:$0xff]   ;;  %v2152_v29 = vld [vmem:[#allocation2 + $0x48] ss:$16 sps:$4 sm:$0xff]  }
  0xbb   : > { %1338 = vmatpush1.bf16.msra.mxu0 %v343_v30  ;;  %v2156_v30 = vld [vmem:[#allocation2 + $0x6c] ss:$16 sps:$4 sm:$0xff]  }
  0xbc   : > { %1339 = vmatprep.subr.bf16.mxu0 %v2408_v0 }
  0xbd   : > { %v334_v31 = vpop.permute.xlu1 %333  ;;  %v332_v32 = vpop.permute.xlu0 %331 }
  0xbe   : > { %v345_v36 = vsel %vm335_vm1, %v332_v32, %v334_v31  ;;  %v2155_v31 = vld [vmem:[#allocation2 + $0x60] ss:$16 sps:$4 sm:$0xff]   ;;  %v2159_v32 = vld [vmem:[#allocation2 + $0x84] ss:$16 sps:$4 sm:$0xff]  }
  0xbf   : > { %1340 = vmatpush1.bf16.msra.mxu0 %v344_v33  ;;  %v2158_v33 = vld [vmem:[#allocation2 + $0x68] ss:$16 sps:$4 sm:$0xff]  }
  0xc0   : > { %1341 = vmatprep.subr.bf16.mxu0 %v2408_v0 }
  0xc1   : > { %v359_v34 = vpop.permute.xlu1 %358  ;;  %v357_v35 = vpop.permute.xlu0 %356 }
  0xc2   : > { %v397_v39 = vsel %vm396_vm2, %v357_v35, %v359_v34  ;;  %v2162_v34 = vld [vmem:[#allocation2 + $0x8c] ss:$16 sps:$4 sm:$0xff]   ;;  %v2161_v35 = vld [vmem:[#allocation2 + $0x80] ss:$16 sps:$4 sm:$0xff]  }
  0xc3   : > { %1342 = vmatpush1.bf16.msra.mxu0 %v345_v36  ;;  %v2165_v36 = vld [vmem:[#allocation2 + $0xa4] ss:$16 sps:$4 sm:$0xff]  }
  0xc4   : > { %1343 = vmatprep.subr.bf16.mxu0 %v2408_v0 }
  0xc5   : > { %v363_v37 = vpop.permute.xlu1 %362  ;;  %v361_v38 = vpop.permute.xlu0 %360 }
  0xc6   : > { %v398_v42 = vsel %vm396_vm2, %v361_v38, %v363_v37  ;;  %v2164_v37 = vld [vmem:[#allocation2 + $0x88] ss:$16 sps:$4 sm:$0xff]   ;;  %v2168_v38 = vld [vmem:[#allocation2 + $0xac] ss:$16 sps:$4 sm:$0xff]  }
  0xc7   : > { %1344 = vmatpush1.bf16.msra.mxu0 %v397_v39  ;;  %v2167_v39 = vld [vmem:[#allocation2 + $0xa0] ss:$16 sps:$4 sm:$0xff]  }
  0xc8   : > { %1345 = vmatprep.subr.bf16.mxu0 %v2408_v0 }
  0xc9   : > { %v367_v40 = vpop.permute.xlu1 %366  ;;  %v365_v41 = vpop.permute.xlu0 %364 }
  0xca   : > { %v399_v45 = vsel %vm396_vm2, %v365_v41, %v367_v40  ;;  %v2171_v40 = vld [vmem:[#allocation2 + $0xc4] ss:$16 sps:$4 sm:$0xff]   ;;  %v2170_v41 = vld [vmem:[#allocation2 + $0xa8] ss:$16 sps:$4 sm:$0xff]  }
  0xcb   : > { %1346 = vmatpush1.bf16.msra.mxu0 %v398_v42  ;;  %v2174_v42 = vld [vmem:[#allocation2 + $0xcc] ss:$16 sps:$4 sm:$0xff]  }
  0xcc   : > { %1347 = vmatprep.subr.bf16.mxu0 %v2408_v0 }
  0xcd   : > { %v371_v43 = vpop.permute.xlu1 %370  ;;  %v369_v44 = vpop.permute.xlu0 %368 }
  0xce   : > { %v400_v49 = vsel %vm396_vm2, %v369_v44, %v371_v43  ;;  %v2173_v43 = vld [vmem:[#allocation2 + $0xc0] ss:$16 sps:$4 sm:$0xff]   ;;  %v2177_v44 = vld [vmem:[#allocation2 + $0xe4] ss:$16 sps:$4 sm:$0xff]  }
  0xcf   : > { %1348 = vmatpush1.bf16.msra.mxu0 %v399_v45  ;;  %v2176_v45 = vld [vmem:[#allocation2 + $0xc8] ss:$16 sps:$4 sm:$0xff]  }
  0xd0   : > { %1349 = vmatprep.subr.bf16.mxu0 %v2408_v0 }
  0xd1   : > { %v298_v46 = vpop.permute.xlu1 %297  ;;  %v296_v47 = vpop.permute.xlu0 %295 }
  0xd2   : > { %v336_v48 = vsel %vm335_vm1, %v296_v47, %v298_v46  ;;  %v2180_v46 = vld [vmem:[#allocation2 + $0xec] ss:$16 sps:$4 sm:$0xff]   ;;  %v2179_v47 = vld [vmem:[#allocation2 + $0xe0] ss:$16 sps:$4 sm:$0xff]  }
  0xd3   : > { %1115 = vmatpush1.bf16.msra.mxu1 %v336_v48  ;;  %1350 = vmatpush1.bf16.msra.mxu0 %v400_v49  ;;  %v2183_v48 = vld [vmem:[#allocation2 + $0x104] ss:$16 sps:$4 sm:$0xff]   ;;  %v2182_v49 = vld [vmem:[#allocation2 + $0xe8] ss:$16 sps:$4 sm:$0xff]  }
  0xd4   : > { %1351 = vmatprep.subr.bf16.mxu0 %v2408_v0  ;;  %1116 = vmatprep.subr.bf16.mxu1 %v2408_v0 }
  0xd5   : > { %v375_v50 = vpop.permute.xlu1 %374  ;;  %v373_v51 = vpop.permute.xlu0 %372 }
  0xd6   : > { %v401_v52 = vsel %vm396_vm2, %v373_v51, %v375_v50  ;;  %v2186_v50 = vld [vmem:[#allocation2 + $0x10c] ss:$16 sps:$4 sm:$0xff]   ;;  %v2185_v51 = vld [vmem:[#allocation2 + $0x100] ss:$16 sps:$4 sm:$0xff]  }
  0xd7   : > { %1352 = vmatpush1.bf16.msra.mxu0 %v401_v52  ;;  %v2189_v52 = vld [vmem:[#allocation2 + $0x124] ss:$16 sps:$4 sm:$0xff]  }
  0xd8   : > { %1353 = vmatprep.subr.bf16.mxu0 %v2408_v0 }
  0xd9   : > { %v302_v53 = vpop.permute.xlu1 %301  ;;  %v300_v54 = vpop.permute.xlu0 %299 }
  0xda   : > { %v337_v55 = vsel %vm335_vm1, %v300_v54, %v302_v53  ;;  %v2188_v53 = vld [vmem:[#allocation2 + $0x108] ss:$16 sps:$4 sm:$0xff]   ;;  %v2192_v54 = vld [vmem:[#allocation2 + $0x12c] ss:$16 sps:$4 sm:$0xff]  }
  0xdb   : > { %1117 = vmatpush1.bf16.msra.mxu1 %v337_v55  ;;  %v2191_v55 = vld [vmem:[#allocation2 + $0x120] ss:$16 sps:$4 sm:$0xff]  }
  0xdc   : > { %1118 = vmatprep.subr.bf16.mxu1 %v2408_v0 }
  0xdd   : > { %v379_v56 = vpop.permute.xlu1 %378  ;;  %v377_v57 = vpop.permute.xlu0 %376 }
  0xde   : > { %v402_v58 = vsel %vm396_vm2, %v377_v57, %v379_v56  ;;  %v2195_v56 = vld [vmem:[#allocation2 + $0x144] ss:$16 sps:$4 sm:$0xff]   ;;  %v2194_v57 = vld [vmem:[#allocation2 + $0x128] ss:$16 sps:$4 sm:$0xff]  }
  0xdf   : > { %1354 = vmatpush1.bf16.msra.mxu0 %v402_v58  ;;  %v2198_v58 = vld [vmem:[#allocation2 + $0x14c] ss:$16 sps:$4 sm:$0xff]  }
  0xe0   : > { %1355 = vmatprep.subr.bf16.mxu0 %v2408_v0 }
  0xe1   : > { %v306_v59 = vpop.permute.xlu1 %305  ;;  %v304_v60 = vpop.permute.xlu0 %303 }
  0xe2   : > { %v338_v61 = vsel %vm335_vm1, %v304_v60, %v306_v59  ;;  %v2197_v59 = vld [vmem:[#allocation2 + $0x140] ss:$16 sps:$4 sm:$0xff]   ;;  %v2201_v60 = vld [vmem:[#allocation2 + $0x164] ss:$16 sps:$4 sm:$0xff]  }
  0xe3   : > { %1119 = vmatpush1.bf16.msra.mxu1 %v338_v61  ;;  %v2200_v61 = vld [vmem:[#allocation2 + $0x148] ss:$16 sps:$4 sm:$0xff]  }
  0xe4   : > { %1120 = vmatprep.subr.bf16.mxu1 %v2408_v0 }
  0xe5   : > { %v383_v62 = vpop.permute.xlu1 %382  ;;  %v381_v63 = vpop.permute.xlu0 %380 }
  0xe6   : > { %v403_v1 = vsel %vm396_vm2, %v381_v63, %v383_v62  ;;  %v2204_v62 = vld [vmem:[#allocation2 + $0x16c] ss:$16 sps:$4 sm:$0xff]   ;;  %v2203_v63 = vld [vmem:[#allocation2 + $0x160] ss:$16 sps:$4 sm:$0xff]  }
  0xe7   : > { %1356 = vmatpush1.bf16.msra.mxu0 %v403_v1  ;;  %v2207_v1 = vld [vmem:[#allocation2 + $0x184] ss:$16 sps:$4 sm:$0xff]  }
  0xe8   : > { %1357 = vmatprep.subr.bf16.mxu0 %v2408_v0 }
  0xe9   : > { %v310_v2 = vpop.permute.xlu1 %309  ;;  %v308_v3 = vpop.permute.xlu0 %307 }
  0xea   : > { %v339_v4 = vsel %vm335_vm1, %v308_v3, %v310_v2  ;;  %v2206_v2 = vld [vmem:[#allocation2 + $0x168] ss:$16 sps:$4 sm:$0xff]   ;;  %v2210_v3 = vld [vmem:[#allocation2 + $0x18c] ss:$16 sps:$4 sm:$0xff]  }
  0xeb   : > { %1121 = vmatpush1.bf16.msra.mxu1 %v339_v4  ;;  %v2209_v4 = vld [vmem:[#allocation2 + $0x180] ss:$16 sps:$4 sm:$0xff]  }
  0xec   : > { %1122 = vmatprep.subr.bf16.mxu1 %v2408_v0 }
  0xed   : > { %v387_v5 = vpop.permute.xlu1 %386  ;;  %v385_v6 = vpop.permute.xlu0 %384 }
  0xee   : > { %v404_v7 = vsel %vm396_vm2, %v385_v6, %v387_v5  ;;  %v2213_v5 = vld [vmem:[#allocation2 + $0x1a4] ss:$16 sps:$4 sm:$0xff]   ;;  %v2212_v6 = vld [vmem:[#allocation2 + $0x188] ss:$16 sps:$4 sm:$0xff]  }
  0xef   : > { %1358 = vmatpush1.bf16.msra.mxu0 %v404_v7  ;;  %v2216_v7 = vld [vmem:[#allocation2 + $0x1ac] ss:$16 sps:$4 sm:$0xff]  }
  0xf0   : > { %1359 = vmatprep.subr.bf16.mxu0 %v2408_v0 }
  0xf1   : > { %v314_v8 = vpop.permute.xlu1 %313  ;;  %v312_v9 = vpop.permute.xlu0 %311 }
  0xf2   : > { %v340_v10 = vsel %vm335_vm1, %v312_v9, %v314_v8  ;;  %v2215_v8 = vld [vmem:[#allocation2 + $0x1a0] ss:$16 sps:$4 sm:$0xff]   ;;  %v2219_v9 = vld [vmem:[#allocation2 + $0x1c4] ss:$16 sps:$4 sm:$0xff]  }
  0xf3   : > { %1123 = vmatpush1.bf16.msra.mxu1 %v340_v10  ;;  %v2218_v10 = vld [vmem:[#allocation2 + $0x1a8] ss:$16 sps:$4 sm:$0xff]  }
  0xf4   : > { %1124 = vmatprep.subr.bf16.mxu1 %v2408_v0 }
  0xf5   : > { %v391_v11 = vpop.permute.xlu1 %390  ;;  %v389_v12 = vpop.permute.xlu0 %388 }
  0xf6   : > { %v405_v13 = vsel %vm396_vm2, %v389_v12, %v391_v11  ;;  %v2222_v11 = vld [vmem:[#allocation2 + $0x1cc] ss:$16 sps:$4 sm:$0xff]   ;;  %v2221_v12 = vld [vmem:[#allocation2 + $0x1c0] ss:$16 sps:$4 sm:$0xff]  }
  0xf7   : > { %1360 = vmatpush1.bf16.msra.mxu0 %v405_v13  ;;  %v2225_v13 = vld [vmem:[#allocation2 + $0x1e4] ss:$16 sps:$4 sm:$0xff]  }
  0xf8   : > { %1361 = vmatprep.subr.bf16.mxu0 %v2408_v0  ;;  %v2147_v0 = vld [vmem:[#allocation2 + $0x44] ss:$16 sps:$4 sm:$0xff]  }
  0xf9   : > { %v318_v14 = vpop.permute.xlu1 %317  ;;  %v316_v15 = vpop.permute.xlu0 %315 }
  0xfa   : > { %v341_v16 = vsel %vm335_vm1, %v316_v15, %v318_v14  ;;  %v2224_v14 = vld [vmem:[#allocation2 + $0x1c8] ss:$16 sps:$4 sm:$0xff]   ;;  %v2228_v15 = vld [vmem:[#allocation2 + $0x1ec] ss:$16 sps:$4 sm:$0xff]  }
  0xfb   : > { %1125 = vmatpush1.bf16.msra.mxu1 %v341_v16  ;;  %v2227_v16 = vld [vmem:[#allocation2 + $0x1e0] ss:$16 sps:$4 sm:$0xff]  }
  0xfd   : > { %v395_v19 = vpop.permute.xlu1 %394  ;;  %v393_v20 = vpop.permute.xlu0 %392 }
  0xfe   : > { %1127 = vmatmul.mubr.bf16.vlgmr.msra.gmra.mrb[0].mxu1 %v2135_v17  ;;  %v406_v21 = vsel %vm396_vm2, %v393_v20, %v395_v19  ;;  %v2231_v17 = vld [vmem:[#allocation2 + $0x204] ss:$16 sps:$4 sm:$0xff]   ;;  %v2234_v19 = vld [vmem:[#allocation2 + $0x20c] ss:$16 sps:$4 sm:$0xff]   ;;  %v2233_v20 = vld [vmem:[#allocation2 + $0x200] ss:$16 sps:$4 sm:$0xff]  }
  0xff   : > { %1362 = vmatpush1.bf16.msra.mxu0 %v406_v21  ;;  %1134 = vmatprep.mubr.bf16.mxu1 %v2141_v18  ;;  %v2230_v18 = vld [vmem:[#allocation2 + $0x1e8] ss:$16 sps:$4 sm:$0xff]   ;;  %v2237_v21 = vld [vmem:[#allocation2 + $0x224] ss:$16 sps:$4 sm:$0xff]  }
 0x102   : > { %1368 = vmatmul.mubr.bf16.vlgmr.msra.gmra.mrb[0].mxu0 %v2138_v22  ;;  %v2236_v22 = vld [vmem:[#allocation2 + $0x208] ss:$16 sps:$4 sm:$0xff]  }
 0x103   : > { %1953 = vmatprep.mubr.msk.bf16.mxu0 %vm1015_vm0, %v2144_v23  ;;  %v2240_v23 = vld [vmem:[#allocation2 + $0x22c] ss:$16 sps:$4 sm:$0xff]  }
 0x106   : > { %1135 = vmatmul.mubr.bf16.gmra.mrb[4].mxu1 %v2143_v24  ;;  %v2239_v24 = vld [vmem:[#allocation2 + $0x220] ss:$16 sps:$4 sm:$0xff]  }
 0x107   : > { %1142 = vmatprep.mubr.bf16.mxu1 %v2147_v0  ;;  %v2243_v0 = vld [vmem:[#allocation2 + $0x244] ss:$16 sps:$4 sm:$0xff]  }
 0x10a   : > { %1376 = vmatmul.mubr.bf16.gmra.mrb[4].mxu0 %v2146_v25  ;;  %v2242_v25 = vld [vmem:[#allocation2 + $0x228] ss:$16 sps:$4 sm:$0xff]  }
 0x10b   : > { %1954 = vmatprep.mubr.msk.bf16.mxu0 %vm1015_vm0, %v2150_v26  ;;  %v2246_v26 = vld [vmem:[#allocation2 + $0x24c] ss:$16 sps:$4 sm:$0xff]  }
 0x10e   : > { %1143 = vmatmul.mubr.bf16.gmra.mrb[8].mxu1 %v2149_v27  ;;  %v2245_v27 = vld [vmem:[#allocation2 + $0x240] ss:$16 sps:$4 sm:$0xff]  }
 0x10f   : > { %1150 = vmatprep.mubr.bf16.mxu1 %v2153_v28  ;;  %v2249_v28 = vld [vmem:[#allocation2 + $0x264] ss:$16 sps:$4 sm:$0xff]  }
 0x112   : > { %1384 = vmatmul.mubr.bf16.gmra.mrb[8].mxu0 %v2152_v29  ;;  %v2248_v29 = vld [vmem:[#allocation2 + $0x248] ss:$16 sps:$4 sm:$0xff]  }
 0x113   : > { %1955 = vmatprep.mubr.msk.bf16.mxu0 %vm1015_vm0, %v2156_v30  ;;  %v2252_v30 = vld [vmem:[#allocation2 + $0x26c] ss:$16 sps:$4 sm:$0xff]  }
 0x116   : > { %1151 = vmatmul.mubr.bf16.gmra.mrb[12].mxu1 %v2155_v31  ;;  %v2251_v31 = vld [vmem:[#allocation2 + $0x260] ss:$16 sps:$4 sm:$0xff]  }
 0x117   : > { %1158 = vmatprep.mubr.bf16.mxu1 %v2159_v32  ;;  %v2255_v32 = vld [vmem:[#allocation2 + $0x284] ss:$16 sps:$4 sm:$0xff]  }
 0x11a   : > { %1392 = vmatmul.mubr.bf16.gmra.mrb[12].mxu0 %v2158_v33  ;;  %v2254_v33 = vld [vmem:[#allocation2 + $0x268] ss:$16 sps:$4 sm:$0xff]  }
 0x11b   : > { %1956 = vmatprep.mubr.msk.bf16.mxu0 %vm1015_vm0, %v2162_v34  ;;  %v2258_v34 = vld [vmem:[#allocation2 + $0x28c] ss:$16 sps:$4 sm:$0xff]  }
 0x11e   : > { %1159 = vmatmul.mubr.bf16.gmra.mrb[16].mxu1 %v2161_v35  ;;  %v2257_v35 = vld [vmem:[#allocation2 + $0x280] ss:$16 sps:$4 sm:$0xff]  }
 0x11f   : > { %1166 = vmatprep.mubr.bf16.mxu1 %v2165_v36  ;;  %v2261_v36 = vld [vmem:[#allocation2 + $0x2a4] ss:$16 sps:$4 sm:$0xff]  }
 0x122   : > { %1400 = vmatmul.mubr.bf16.gmra.mrb[16].mxu0 %v2164_v37  ;;  %v2260_v37 = vld [vmem:[#allocation2 + $0x288] ss:$16 sps:$4 sm:$0xff]  }
 0x123   : > { %1957 = vmatprep.mubr.msk.bf16.mxu0 %vm1015_vm0, %v2168_v38  ;;  %v2264_v38 = vld [vmem:[#allocation2 + $0x2ac] ss:$16 sps:$4 sm:$0xff]  }
 0x126   : > { %1167 = vmatmul.mubr.bf16.gmra.mrb[20].mxu1 %v2167_v39  ;;  %v2263_v39 = vld [vmem:[#allocation2 + $0x2a0] ss:$16 sps:$4 sm:$0xff]  }
 0x127   : > { %1174 = vmatprep.mubr.bf16.mxu1 %v2171_v40  ;;  %v2267_v40 = vld [vmem:[#allocation2 + $0x2c4] ss:$16 sps:$4 sm:$0xff]  }
 0x12a   : > { %1408 = vmatmul.mubr.bf16.gmra.mrb[20].mxu0 %v2170_v41  ;;  %v2266_v41 = vld [vmem:[#allocation2 + $0x2a8] ss:$16 sps:$4 sm:$0xff]  }
 0x12b   : > { %1958 = vmatprep.mubr.msk.bf16.mxu0 %vm1015_vm0, %v2174_v42  ;;  %v2270_v42 = vld [vmem:[#allocation2 + $0x2cc] ss:$16 sps:$4 sm:$0xff]  }
 0x12e   : > { %1175 = vmatmul.mubr.bf16.gmra.mrb[24].mxu1 %v2173_v43  ;;  %v2269_v43 = vld [vmem:[#allocation2 + $0x2c0] ss:$16 sps:$4 sm:$0xff]  }
 0x12f   : > { %1182 = vmatprep.mubr.bf16.mxu1 %v2177_v44  ;;  %v2273_v44 = vld [vmem:[#allocation2 + $0x2e4] ss:$16 sps:$4 sm:$0xff]  }
 0x132   : > { %1416 = vmatmul.mubr.bf16.gmra.mrb[24].mxu0 %v2176_v45  ;;  %v2272_v45 = vld [vmem:[#allocation2 + $0x2c8] ss:$16 sps:$4 sm:$0xff]  }
 0x133   : > { %1959 = vmatprep.mubr.msk.bf16.mxu0 %vm1015_vm0, %v2180_v46  ;;  %v2276_v46 = vld [vmem:[#allocation2 + $0x2ec] ss:$16 sps:$4 sm:$0xff]  }
 0x136   : > { %1183 = vmatmul.mubr.bf16.gmra.mrb[28].mxu1 %v2179_v47  ;;  %v2275_v47 = vld [vmem:[#allocation2 + $0x2e0] ss:$16 sps:$4 sm:$0xff]  }
 0x137   : > { %1190 = vmatprep.mubr.bf16.mxu1 %v2183_v48  ;;  %v2279_v48 = vld [vmem:[#allocation2 + $0x304] ss:$16 sps:$4 sm:$0xff]  }
 0x13a   : > { %1424 = vmatmul.mubr.bf16.gmra.mrb[28].mxu0 %v2182_v49  ;;  %v2278_v49 = vld [vmem:[#allocation2 + $0x2e8] ss:$16 sps:$4 sm:$0xff]  }
 0x13b   : > { %1960 = vmatprep.mubr.msk.bf16.mxu0 %vm1015_vm0, %v2186_v50  ;;  %v2282_v50 = vld [vmem:[#allocation2 + $0x30c] ss:$16 sps:$4 sm:$0xff]  }
 0x13e   : > { %1191 = vmatmul.mubr.bf16.gmra.mrb[32].mxu1 %v2185_v51  ;;  %v2281_v51 = vld [vmem:[#allocation2 + $0x300] ss:$16 sps:$4 sm:$0xff]  }
 0x13f   : > { %1198 = vmatprep.mubr.bf16.mxu1 %v2189_v52  ;;  %v2285_v52 = vld [vmem:[#allocation2 + $0x324] ss:$16 sps:$4 sm:$0xff]  }
 0x142   : > { %1432 = vmatmul.mubr.bf16.gmra.mrb[32].mxu0 %v2188_v53  ;;  %v2284_v53 = vld [vmem:[#allocation2 + $0x308] ss:$16 sps:$4 sm:$0xff]  }
 0x143   : > { %1961 = vmatprep.mubr.msk.bf16.mxu0 %vm1015_vm0, %v2192_v54  ;;  %v2288_v54 = vld [vmem:[#allocation2 + $0x32c] ss:$16 sps:$4 sm:$0xff]  }
 0x146   : > { %1199 = vmatmul.mubr.bf16.gmra.mrb[36].mxu1 %v2191_v55  ;;  %v2287_v55 = vld [vmem:[#allocation2 + $0x320] ss:$16 sps:$4 sm:$0xff]  }
 0x147   : > { %1206 = vmatprep.mubr.bf16.mxu1 %v2195_v56  ;;  %v2290_v56 = vld [vmem:[#allocation2 + $0x328] ss:$16 sps:$4 sm:$0xff]  }
 0x14a   : > { %1440 = vmatmul.mubr.bf16.gmra.mrb[36].mxu0 %v2194_v57 }
 0x14b   : > { %1962 = vmatprep.mubr.msk.bf16.mxu0 %vm1015_vm0, %v2198_v58 }
 0x14e   : > { %1207 = vmatmul.mubr.bf16.gmra.mrb[40].mxu1 %v2197_v59 }
 0x14f   : > { %1214 = vmatprep.mubr.bf16.mxu1 %v2201_v60 }
 0x152   : > { %1448 = vmatmul.mubr.bf16.gmra.mrb[40].mxu0 %v2200_v61 }
 0x153   : > { %1963 = vmatprep.mubr.msk.bf16.mxu0 %vm1015_vm0, %v2204_v62 }
 0x156   : > { %1215 = vmatmul.mubr.bf16.gmra.mrb[44].mxu1 %v2203_v63 }
 0x157   : > { %1222 = vmatprep.mubr.bf16.mxu1 %v2207_v1 }
 0x15a   : > { %1456 = vmatmul.mubr.bf16.gmra.mrb[44].mxu0 %v2206_v2 }
 0x15b   : > { %1964 = vmatprep.mubr.msk.bf16.mxu0 %vm1015_vm0, %v2210_v3 }
 0x15e   : > { %1223 = vmatmul.mubr.bf16.gmra.mrb[48].mxu1 %v2209_v4 }
 0x15f   : > { %1230 = vmatprep.mubr.bf16.mxu1 %v2213_v5 }
 0x162   : > { %1464 = vmatmul.mubr.bf16.gmra.mrb[48].mxu0 %v2212_v6 }
 0x163   : > { %1965 = vmatprep.mubr.msk.bf16.mxu0 %vm1015_vm0, %v2216_v7 }
 0x166   : > { %1231 = vmatmul.mubr.bf16.gmra.mrb[52].mxu1 %v2215_v8 }
 0x167   : > { %1238 = vmatprep.mubr.bf16.mxu1 %v2219_v9 }
 0x16a   : > { %1472 = vmatmul.mubr.bf16.gmra.mrb[52].mxu0 %v2218_v10 }
 0x16b   : > { %1966 = vmatprep.mubr.msk.bf16.mxu0 %vm1015_vm0, %v2222_v11 }
 0x16e   : > { %1239 = vmatmul.mubr.bf16.gmra.mrb[56].mxu1 %v2221_v12 }
 0x16f   : > { %1246 = vmatprep.mubr.bf16.mxu1 %v2225_v13 }
 0x172   : > { %1480 = vmatmul.mubr.bf16.gmra.mrb[56].mxu0 %v2224_v14 }
 0x173   : > { %1967 = vmatprep.mubr.msk.bf16.mxu0 %vm1015_vm0, %v2228_v15 }
 0x176   : > { %1247 = vmatmul.mubr.bf16.gmra.mrb[60].mxu1 %v2227_v16 }
 0x177   : > { %1254 = vmatprep.mubr.bf16.mxu1 %v2231_v17 }
 0x17a   : > { %1488 = vmatmul.mubr.bf16.gmra.mrb[60].mxu0 %v2230_v18 }
 0x17b   : > { %1968 = vmatprep.mubr.msk.bf16.mxu0 %vm1015_vm0, %v2234_v19 }
 0x17e   : > { %1255 = vmatmul.mubr.bf16.gmra.mrb[64].mxu1 %v2233_v20 }
 0x17f   : > { %1262 = vmatprep.mubr.bf16.mxu1 %v2237_v21 }
 0x182   : > { %1496 = vmatmul.mubr.bf16.gmra.mrb[64].mxu0 %v2236_v22 }
 0x183   : > { %1969 = vmatprep.mubr.msk.bf16.mxu0 %vm1015_vm0, %v2240_v23 }
 0x186   : > { %1263 = vmatmul.mubr.bf16.gmra.mrb[68].mxu1 %v2239_v24 }
 0x187   : > { %1270 = vmatprep.mubr.bf16.mxu1 %v2243_v0 }
 0x18a   : > { %1504 = vmatmul.mubr.bf16.gmra.mrb[68].mxu0 %v2242_v25 }
 0x18b   : > { %1970 = vmatprep.mubr.msk.bf16.mxu0 %vm1015_vm0, %v2246_v26 }
 0x18e   : > { %1271 = vmatmul.mubr.bf16.gmra.mrb[72].mxu1 %v2245_v27 }
 0x18f   : > { %1278 = vmatprep.mubr.bf16.mxu1 %v2249_v28 }
 0x192   : > { %1512 = vmatmul.mubr.bf16.gmra.mrb[72].mxu0 %v2248_v29 }
 0x193   : > { %1971 = vmatprep.mubr.msk.bf16.mxu0 %vm1015_vm0, %v2252_v30 }
 0x196   : > { %1279 = vmatmul.mubr.bf16.gmra.mrb[76].mxu1 %v2251_v31 }
 0x197   : > { %1286 = vmatprep.mubr.bf16.mxu1 %v2255_v32 }
 0x19a   : > { %1520 = vmatmul.mubr.bf16.gmra.mrb[76].mxu0 %v2254_v33 }
 0x19b   : > { %1972 = vmatprep.mubr.msk.bf16.mxu0 %vm1015_vm0, %v2258_v34 }
 0x19e   : > { %1287 = vmatmul.mubr.bf16.gmra.mrb[80].mxu1 %v2257_v35 }
 0x19f   : > { %1294 = vmatprep.mubr.bf16.mxu1 %v2261_v36 }
 0x1a2   : > { %1528 = vmatmul.mubr.bf16.gmra.mrb[80].mxu0 %v2260_v37 }
 0x1a3   : > { %1973 = vmatprep.mubr.msk.bf16.mxu0 %vm1015_vm0, %v2264_v38 }
 0x1a6   : > { %1295 = vmatmul.mubr.bf16.gmra.mrb[84].mxu1 %v2263_v39 }
 0x1a7   : > { %1302 = vmatprep.mubr.bf16.mxu1 %v2267_v40 }
 0x1aa   : > { %1536 = vmatmul.mubr.bf16.gmra.mrb[84].mxu0 %v2266_v41 }
 0x1ab   : > { %1974 = vmatprep.mubr.msk.bf16.mxu0 %vm1015_vm0, %v2270_v42 }
 0x1ae   : > { %1303 = vmatmul.mubr.bf16.gmra.mrb[88].mxu1 %v2269_v43 }
 0x1af   : > { %1310 = vmatprep.mubr.bf16.mxu1 %v2273_v44 }
 0x1b2   : > { %1544 = vmatmul.mubr.bf16.gmra.mrb[88].mxu0 %v2272_v45 }
 0x1b3   : > { %1975 = vmatprep.mubr.msk.bf16.mxu0 %vm1015_vm0, %v2276_v46 }
 0x1b6   : > { %1311 = vmatmul.mubr.bf16.gmra.mrb[92].mxu1 %v2275_v47 }
 0x1b7   : > { %1318 = vmatprep.mubr.bf16.mxu1 %v2279_v48 }
 0x1ba   : > { %1552 = vmatmul.mubr.bf16.gmra.mrb[92].mxu0 %v2278_v49 }
 0x1bb   : > { %1976 = vmatprep.mubr.msk.bf16.mxu0 %vm1015_vm0, %v2282_v50 }
 0x1be   : > { %1319 = vmatmul.mubr.bf16.gmra.mrb[96].mxu1 %v2281_v51 }
 0x1bf   : > { %1326 = vmatprep.mubr.bf16.mxu1 %v2285_v52 }
 0x1c2   : > { %1560 = vmatmul.mubr.bf16.gmra.mrb[96].mxu0 %v2284_v53 }
 0x1c3   : > { %1977 = vmatprep.mubr.msk.bf16.mxu0 %vm1015_vm0, %v2288_v54 }
 0x1c6   : > { %1327 = vmatmul.mubr.bf16.gmra.mrb[100].mxu1 %v2287_v55 }
 0x1ca   : > { %1568 = vmatmul.mubr.bf16.gmra.mrb[100].mxu0 %v2290_v56 }
 0x1d1   : > { %v1128_v57 = vpop.f32.mrb[0].mxu1 }
 0x1d2   : > { %v1130_v58 = vpop.f32.mrb[1].mxu1 }
 0x1d3   : > { %v1131_v59 = vpop.f32.mrb[2].mxu1 }
 0x1d4   : > { %v1133_v60 = vpop.f32.mrb[3].mxu1 }
 0x1d5   : > { %v1369_v61 = vpop.f32.mrb[0].mxu0 }
 0x1d6   : > { %v2695_v62 = vadd.f32 %v1369_v61, %v1128_v57  ;;  %v1371_v63 = vpop.f32.mrb[1].mxu0 }
 0x1d7   : > { %v1372_v1 = vpop.f32.mrb[2].mxu0 }
 0x1d8   : > { %v2697_v2 = vadd.f32 %v1372_v1, %v1131_v59  ;;  %v1374_v3 = vpop.f32.mrb[3].mxu0 }
 0x1d9   : > { %v1136_v4 = vpop.f32.mrb[4].mxu1 }
 0x1da   : > { %v1138_v5 = vpop.f32.mrb[5].mxu1 }
 0x1db   : > { %v1139_v6 = vpop.f32.mrb[6].mxu1 }
 0x1dc   : > { %v1141_v7 = vpop.f32.mrb[7].mxu1 }
 0x1dd   : > { %v1377_v8 = vpop.f32.mrb[4].mxu0 }
 0x1de   : > { %v2699_v9 = vadd.f32 %v1377_v8, %v1136_v4  ;;  %v1379_v10 = vpop.f32.mrb[5].mxu0 }
 0x1df   : > { %v1380_v11 = vpop.f32.mrb[6].mxu0 }
 0x1e0   : > { %v2701_v12 = vadd.f32 %v1380_v11, %v1139_v6  ;;  %v1382_v13 = vpop.f32.mrb[7].mxu0 }
 0x1e1   : > { %v1144_v14 = vpop.f32.mrb[8].mxu1 }
 0x1e2   : > { %v1146_v15 = vpop.f32.mrb[9].mxu1 }
 0x1e3   : > { %v1147_v16 = vpop.f32.mrb[10].mxu1 }
 0x1e4   : > { %v1149_v17 = vpop.f32.mrb[11].mxu1 }
 0x1e5   : > { %v1385_v18 = vpop.f32.mrb[8].mxu0 }
 0x1e6   : > { %v2703_v19 = vadd.f32 %v1385_v18, %v1144_v14  ;;  %v1387_v20 = vpop.f32.mrb[9].mxu0 }
 0x1e7   : > { %v1388_v21 = vpop.f32.mrb[10].mxu0 }
 0x1e8   : > { %v2705_v22 = vadd.f32 %v1388_v21, %v1147_v16  ;;  %v1390_v23 = vpop.f32.mrb[11].mxu0 }
 0x1e9   : > { %v1152_v24 = vpop.f32.mrb[12].mxu1 }
 0x1ea   : > { %v1154_v0 = vpop.f32.mrb[13].mxu1 }
 0x1eb   : > { %v1155_v25 = vpop.f32.mrb[14].mxu1 }
 0x1ec   : > { %v1157_v26 = vpop.f32.mrb[15].mxu1 }
 0x1ed   : > { %v1393_v27 = vpop.f32.mrb[12].mxu0 }
 0x1ee   : > { %v2707_v28 = vadd.f32 %v1393_v27, %v1152_v24  ;;  %v1395_v29 = vpop.f32.mrb[13].mxu0 }
 0x1ef   : > { %v1396_v30 = vpop.f32.mrb[14].mxu0 }
 0x1f0   : > { %v2709_v31 = vadd.f32 %v1396_v30, %v1155_v25  ;;  %v1398_v32 = vpop.f32.mrb[15].mxu0 }
 0x1f1   : > { %v1160_v33 = vpop.f32.mrb[16].mxu1 }
 0x1f2   : > { %v1162_v34 = vpop.f32.mrb[17].mxu1 }
 0x1f3   : > { %v1163_v35 = vpop.f32.mrb[18].mxu1 }
 0x1f4   : > { %v1165_v36 = vpop.f32.mrb[19].mxu1 }
 0x1f5   : > { %v1401_v37 = vpop.f32.mrb[16].mxu0 }
 0x1f6   : > { %v2711_v38 = vadd.f32 %v1401_v37, %v1160_v33  ;;  %v1403_v39 = vpop.f32.mrb[17].mxu0 }
 0x1f7   : > { %v1404_v40 = vpop.f32.mrb[18].mxu0 }
 0x1f8   : > { %v2713_v41 = vadd.f32 %v1404_v40, %v1163_v35  ;;  %v1406_v42 = vpop.f32.mrb[19].mxu0 }
 0x1f9   : > { %v1168_v43 = vpop.f32.mrb[20].mxu1 }
 0x1fa   : > { %v1170_v44 = vpop.f32.mrb[21].mxu1 }
 0x1fb   : > { %v1171_v45 = vpop.f32.mrb[22].mxu1 }
 0x1fc   : > { %v1173_v46 = vpop.f32.mrb[23].mxu1 }
 0x1fd   : > { %v1409_v47 = vpop.f32.mrb[20].mxu0 }
 0x1fe   : > { %v2715_v48 = vadd.f32 %v1409_v47, %v1168_v43  ;;  %v1411_v49 = vpop.f32.mrb[21].mxu0 }
 0x1ff   : > { %v1412_v50 = vpop.f32.mrb[22].mxu0 }
 0x200   : > { %v2717_v51 = vadd.f32 %v1412_v50, %v1171_v45  ;;  %v1414_v52 = vpop.f32.mrb[23].mxu0 }
 0x201   : > { %v1176_v53 = vpop.f32.mrb[24].mxu1 }
 0x202   : > { %v1178_v54 = vpop.f32.mrb[25].mxu1 }
 0x203   : > { %v1179_v55 = vpop.f32.mrb[26].mxu1 }
 0x204   : > { %v1181_v56 = vpop.f32.mrb[27].mxu1 }
 0x205   : > { %v1417_v57 = vpop.f32.mrb[24].mxu0 }
 0x206   : > { %v2719_v58 = vadd.f32 %v1417_v57, %v1176_v53  ;;  %v1419_v59 = vpop.f32.mrb[25].mxu0 }
 0x207   : > { %v1420_v60 = vpop.f32.mrb[26].mxu0 }
 0x208   : > { %v2721_v61 = vadd.f32 %v1420_v60, %v1179_v55  ;;  %v1422_v63 = vpop.f32.mrb[27].mxu0 }
 0x209   : > { %v1184_v1 = vpop.f32.mrb[28].mxu1 }
 0x20a   : > { %v1186_v3 = vpop.f32.mrb[29].mxu1 }
 0x20b   : > { %v1187_v4 = vpop.f32.mrb[30].mxu1 }
 0x20c   : > { %v1189_v5 = vpop.f32.mrb[31].mxu1 }
 0x20d   : > { %v1425_v6 = vpop.f32.mrb[28].mxu0 }
 0x20e   : > { %v2723_v7 = vadd.f32 %v1425_v6, %v1184_v1  ;;  %v1427_v8 = vpop.f32.mrb[29].mxu0 }
 0x20f   : > { %v1428_v10 = vpop.f32.mrb[30].mxu0 }
 0x210   : > { %v2725_v11 = vadd.f32 %v1428_v10, %v1187_v4  ;;  %v1430_v13 = vpop.f32.mrb[31].mxu0 }
 0x211   : > { %v1192_v14 = vpop.f32.mrb[32].mxu1 }
 0x212   : > { %v1194_v15 = vpop.f32.mrb[33].mxu1 }
 0x213   : > { %v1195_v16 = vpop.f32.mrb[34].mxu1 }
 0x214   : > { %v1197_v17 = vpop.f32.mrb[35].mxu1 }
 0x215   : > { %v1433_v18 = vpop.f32.mrb[32].mxu0 }
 0x216   : > { %v2727_v20 = vadd.f32 %v1433_v18, %v1192_v14  ;;  %v1435_v21 = vpop.f32.mrb[33].mxu0 }
 0x217   : > { %v1436_v23 = vpop.f32.mrb[34].mxu0 }
 0x218   : > { %v2729_v24 = vadd.f32 %v1436_v23, %v1195_v16  ;;  %v1438_v0 = vpop.f32.mrb[35].mxu0 }
 0x219   : > { %v1200_v25 = vpop.f32.mrb[36].mxu1 }
 0x21a   : > { %v1202_v26 = vpop.f32.mrb[37].mxu1 }
 0x21b   : > { %v1203_v27 = vpop.f32.mrb[38].mxu1 }
 0x21c   : > { %v1205_v29 = vpop.f32.mrb[39].mxu1 }
 0x21d   : > { %v1441_v30 = vpop.f32.mrb[36].mxu0 }
 0x21e   : > { %v2731_v32 = vadd.f32 %v1441_v30, %v1200_v25  ;;  %v1443_v33 = vpop.f32.mrb[37].mxu0 }
 0x21f   : > { %v1444_v34 = vpop.f32.mrb[38].mxu0 }
 0x220   : > { %v2733_v35 = vadd.f32 %v1444_v34, %v1203_v27  ;;  %v1446_v36 = vpop.f32.mrb[39].mxu0  ;;  %v1576_v27 = vmul.f32 %v2695_v62, %v2695_v62 }
 0x221   : > { %v1208_v37 = vpop.f32.mrb[40].mxu1  ;;  %v1577_v36 = vmul.f32 %v2697_v2, %v2697_v2 }
 0x222   : > { %v1210_v39 = vpop.f32.mrb[41].mxu1 }
 0x223   : > { %v1211_v40 = vpop.f32.mrb[42].mxu1 }
 0x224   : > { %v1213_v42 = vpop.f32.mrb[43].mxu1 }
 0x225   : > { %v1449_v43 = vpop.f32.mrb[40].mxu0 }
 0x226   : > { %v2735_v44 = vadd.f32 %v1449_v43, %v1208_v37  ;;  %v1451_v45 = vpop.f32.mrb[41].mxu0 }
 0x227   : > { %v1452_v46 = vpop.f32.mrb[42].mxu0 }
 0x228   : > { %v2737_v47 = vadd.f32 %v1452_v46, %v1211_v40  ;;  %v1454_v49 = vpop.f32.mrb[43].mxu0 }
 0x229   : > { %v1216_v50 = vpop.f32.mrb[44].mxu1 }
 0x22a   : > { %v1218_v52 = vpop.f32.mrb[45].mxu1 }
 0x22b   : > { %v1219_v53 = vpop.f32.mrb[46].mxu1 }
 0x22c   : > { %v1221_v54 = vpop.f32.mrb[47].mxu1 }
 0x22d   : > { %v1457_v55 = vpop.f32.mrb[44].mxu0 }
 0x22e   : > { %v2739_v56 = vadd.f32 %v1457_v55, %v1216_v50  ;;  %v1459_v57 = vpop.f32.mrb[45].mxu0 }
 0x22f   : > { %v1460_v59 = vpop.f32.mrb[46].mxu0 }
 0x230   : > { %v2741_v60 = vadd.f32 %v1460_v59, %v1219_v53  ;;  %v1462_v63 = vpop.f32.mrb[47].mxu0  ;;  %v1578_v53 = vmul.f32 %v2699_v9, %v2699_v9  ;;  %v1579_v59 = vmul.f32 %v2701_v12, %v2701_v12 }
 0x231   : > { %v1224_v1 = vpop.f32.mrb[48].mxu1 }
 0x232   : > { %v1226_v3 = vpop.f32.mrb[49].mxu1 }
 0x233   : > { %v1227_v4 = vpop.f32.mrb[50].mxu1 }
 0x234   : > { %v1229_v5 = vpop.f32.mrb[51].mxu1 }
 0x235   : > { %v1465_v6 = vpop.f32.mrb[48].mxu0 }
 0x236   : > { %v2743_v8 = vadd.f32 %v1465_v6, %v1224_v1  ;;  %v1467_v10 = vpop.f32.mrb[49].mxu0 }
 0x237   : > { %v1468_v13 = vpop.f32.mrb[50].mxu0 }
 0x238   : > { %v2745_v14 = vadd.f32 %v1468_v13, %v1227_v4  ;;  %v1470_v15 = vpop.f32.mrb[51].mxu0 }
 0x239   : > { %v1232_v16 = vpop.f32.mrb[52].mxu1 }
 0x23a   : > { %v1234_v17 = vpop.f32.mrb[53].mxu1 }
 0x23b   : > { %v1235_v18 = vpop.f32.mrb[54].mxu1 }
 0x23c   : > { %v1237_v21 = vpop.f32.mrb[55].mxu1 }
 0x23d   : > { %v1473_v23 = vpop.f32.mrb[52].mxu0 }
 0x23e   : > { %v1474_v0 = vadd.f32 %v1473_v23, %v1232_v16  ;;  %v1475_v25 = vpop.f32.mrb[53].mxu0 }
 0x23f   : > { %v1476_v26 = vpop.f32.mrb[54].mxu0  ;;  %v1581_v25 = vmul.f32 %v2705_v22, %v2705_v22 }
 0x240   : > { %v1602_v29 = vmul.f32 %v1474_v0, %v1474_v0  ;;  %v1477_v30 = vadd.f32 %v1476_v26, %v1235_v18  ;;  %v1478_v33 = vpop.f32.mrb[55].mxu0  ;;  %v1580_v18 = vmul.f32 %v2703_v19, %v2703_v19 }
 0x241   : > { %v1240_v34 = vpop.f32.mrb[56].mxu1 }
 0x242   : > { %v2751_v37 = vadd.f32 %v1602_v29, %v1576_v27  ;;  %v1603_v39 = vmul.f32 %v1477_v30, %v1477_v30  ;;  %v1242_v40 = vpop.f32.mrb[57].mxu1 }
 0x243   : > { %v1243_v42 = vpop.f32.mrb[58].mxu1 }
 0x244   : > { %v2753_v43 = vadd.f32 %v1603_v39, %v1577_v36  ;;  %v1245_v45 = vpop.f32.mrb[59].mxu1 }
 0x245   : > { %v1481_v46 = vpop.f32.mrb[56].mxu0 }
 0x246   : > { %v1685_v49 = vadd.f32 %v2753_v43, %v2751_v37  ;;  %v1482_v62 = vadd.f32 %v1481_v46, %v1240_v34  ;;  %v1483_v50 = vpop.f32.mrb[57].mxu0 }
 0x247   : > { %v1484_v52 = vpop.f32.mrb[58].mxu0 }
 0x248   : > { %v1604_v54 = vmul.f32 %v1482_v62, %v1482_v62  ;;  %v1485_v2 = vadd.f32 %v1484_v52, %v1243_v42  ;;  %v1486_v55 = vpop.f32.mrb[59].mxu0  ;;  %v1582_v62 = vmul.f32 %v2707_v28, %v2707_v28 }
 0x249   : > { %v1248_v57 = vpop.f32.mrb[60].mxu1 }
 0x24a   : > { %v2761_v63 = vadd.f32 %v1604_v54, %v1578_v53  ;;  %v1605_v1 = vmul.f32 %v1485_v2, %v1485_v2  ;;  %v1250_v3 = vpop.f32.mrb[61].mxu1 }
 0x24b   : > { %v1251_v4 = vpop.f32.mrb[62].mxu1 }
 0x24c   : > { %v1686_v5 = vadd.f32 %v1685_v49, %v2761_v63  ;;  %v2764_v6 = vadd.f32 %v1605_v1, %v1579_v59  ;;  %v1253_v10 = vpop.f32.mrb[63].mxu1 }
 0x24d   : > { %v1489_v13 = vpop.f32.mrb[60].mxu0 }
 0x24e   : > { %v1687_v9 = vadd.f32 %v1686_v5, %v2764_v6  ;;  %v1490_v15 = vadd.f32 %v1489_v13, %v1248_v57  ;;  %v1491_v16 = vpop.f32.mrb[61].mxu0 }
 0x24f   : > { %v1492_v17 = vpop.f32.mrb[62].mxu0 }
 0x250   : > { %v1606_v12 = vmul.f32 %v1490_v15, %v1490_v15  ;;  %v1493_v21 = vadd.f32 %v1492_v17, %v1251_v4  ;;  %v1494_v23 = vpop.f32.mrb[63].mxu0  ;;  %v1584_v15 = vmul.f32 %v2711_v38, %v2711_v38 }
 0x251   : > { %v1256_v0 = vpop.f32.mrb[64].mxu1 }
 0x252   : > { %v1632_v26 = vadd.f32 %v1606_v12, %v1580_v18  ;;  %v1607_v27 = vmul.f32 %v1493_v21, %v1493_v21  ;;  %v1258_v29 = vpop.f32.mrb[65].mxu1 }
 0x253   : > { %v1259_v30 = vpop.f32.mrb[66].mxu1 }
 0x254   : > { %v1654_v33 = vmax.f32 %v2751_v37, %v1632_v26  ;;  %v1688_v34 = vadd.f32 %v1687_v9, %v1632_v26  ;;  %v1633_v36 = vadd.f32 %v1607_v27, %v1581_v25  ;;  %v1261_v39 = vpop.f32.mrb[67].mxu1  ;;  %v1583_v37 = vmul.f32 %v2709_v31, %v2709_v31 }
 0x255   : > { %v1497_v40 = vpop.f32.mrb[64].mxu0 }
 0x256   : > { %v1655_v42 = vmax.f32 %v2753_v43, %v1633_v36  ;;  %v1689_v19 = vadd.f32 %v1688_v34, %v1633_v36  ;;  %v1498_v45 = vadd.f32 %v1497_v40, %v1256_v0  ;;  %v1499_v46 = vpop.f32.mrb[65].mxu0  ;;  %v1586_v40 = vmul.f32 %v2715_v48, %v2715_v48 }
 0x257   : > { %v1500_v49 = vpop.f32.mrb[66].mxu0 }
 0x258   : > { %v1608_v22 = vmul.f32 %v1498_v45, %v1498_v45  ;;  %v1501_v50 = vadd.f32 %v1500_v49, %v1259_v30  ;;  %v1502_v52 = vpop.f32.mrb[67].mxu0 }
 0x259   : > { %v1264_v53 = vpop.f32.mrb[68].mxu1 }
 0x25a   : > { %v1634_v54 = vadd.f32 %v1608_v22, %v1582_v62  ;;  %v1609_v2 = vmul.f32 %v1501_v50, %v1501_v50  ;;  %v1266_v55 = vpop.f32.mrb[69].mxu1 }
 0x25b   : > { %v1267_v57 = vpop.f32.mrb[70].mxu1 }
 0x25c   : > { %v1656_v43 = vmax.f32 %v2761_v63, %v1634_v54  ;;  %v1690_v59 = vadd.f32 %v1689_v19, %v1634_v54  ;;  %v1635_v1 = vadd.f32 %v1609_v2, %v1583_v37  ;;  %v1269_v3 = vpop.f32.mrb[71].mxu1  ;;  %v1585_v63 = vmul.f32 %v2713_v41, %v2713_v41 }
 0x25d   : > { %v1505_v4 = vpop.f32.mrb[68].mxu0 }
 0x25e   : > { %v1657_v5 = vmax.f32 %v2764_v6, %v1635_v1  ;;  %v1691_v28 = vadd.f32 %v1690_v59, %v1635_v1  ;;  %v1506_v10 = vadd.f32 %v1505_v4, %v1264_v53  ;;  %v1507_v13 = vpop.f32.mrb[69].mxu0  ;;  %v1588_v1 = vmul.f32 %v2719_v58, %v2719_v58 }
 0x25f   : > { %v1508_v9 = vpop.f32.mrb[70].mxu0 }
 0x260   : > { %v1610_v31 = vmul.f32 %v1506_v10, %v1506_v10  ;;  %v1509_v16 = vadd.f32 %v1508_v9, %v1267_v57  ;;  %v1510_v17 = vpop.f32.mrb[71].mxu0 }
 0x261   : > { %v1272_v18 = vpop.f32.mrb[72].mxu1 }
 0x262   : > { %v1636_v12 = vadd.f32 %v1610_v31, %v1584_v15  ;;  %v1611_v21 = vmul.f32 %v1509_v16, %v1509_v16  ;;  %v1274_v23 = vpop.f32.mrb[73].mxu1 }
 0x263   : > { %v1275_v0 = vpop.f32.mrb[74].mxu1 }
 0x264   : > { %v2783_v25 = vmax.f32 %v1654_v33, %v1636_v12  ;;  %v1692_v6 = vadd.f32 %v1691_v28, %v1636_v12  ;;  %v1637_v26 = vadd.f32 %v1611_v21, %v1585_v63  ;;  %v1277_v27 = vpop.f32.mrb[75].mxu1  ;;  %v1587_v33 = vmul.f32 %v2717_v51, %v2717_v51 }
 0x265   : > { %v1513_v29 = vpop.f32.mrb[72].mxu0 }
 0x266   : > { %v2785_v30 = vmax.f32 %v1655_v42, %v1637_v26  ;;  %v1693_v38 = vadd.f32 %v1692_v6, %v1637_v26  ;;  %v1514_v34 = vadd.f32 %v1513_v29, %v1272_v18  ;;  %v1515_v36 = vpop.f32.mrb[73].mxu0 }
 0x267   : > { %v1516_v39 = vpop.f32.mrb[74].mxu0 }
 0x268   : > { %v1612_v41 = vmul.f32 %v1514_v34, %v1514_v34  ;;  %v1517_v19 = vadd.f32 %v1516_v39, %v1275_v0  ;;  %v1518_v45 = vpop.f32.mrb[75].mxu0  ;;  %v1590_v0 = vmul.f32 %v2723_v7, %v2723_v7 }
 0x269   : > { %v1280_v46 = vpop.f32.mrb[76].mxu1 }
 0x26a   : > { %v1638_v49 = vadd.f32 %v1612_v41, %v1586_v40  ;;  %v1613_v62 = vmul.f32 %v1517_v19, %v1517_v19  ;;  %v1282_v22 = vpop.f32.mrb[77].mxu1 }
 0x26b   : > { %v1283_v50 = vpop.f32.mrb[78].mxu1 }
 0x26c   : > { %v2791_v42 = vmax.f32 %v1656_v43, %v1638_v49  ;;  %v1694_v52 = vadd.f32 %v1693_v38, %v1638_v49  ;;  %v1639_v53 = vadd.f32 %v1613_v62, %v1587_v33  ;;  %v1285_v37 = vpop.f32.mrb[79].mxu1  ;;  %v1589_v43 = vmul.f32 %v2721_v61, %v2721_v61 }
 0x26d   : > { %v1521_v54 = vpop.f32.mrb[76].mxu0  ;;  %v1592_v62 = vmul.f32 %v2727_v20, %v2727_v20 }
 0x26e   : > { %v2793_v2 = vmax.f32 %v1657_v5, %v1639_v53  ;;  %v1695_v48 = vadd.f32 %v1694_v52, %v1639_v53  ;;  %v1522_v55 = vadd.f32 %v1521_v54, %v1280_v46  ;;  %v1523_v57 = vpop.f32.mrb[77].mxu0 }
 0x26f   : > { %v1524_v59 = vpop.f32.mrb[78].mxu0 }
 0x270   : > { %v1614_v51 = vmul.f32 %v1522_v55, %v1522_v55  ;;  %v1525_v3 = vadd.f32 %v1524_v59, %v1283_v50  ;;  %v1526_v4 = vpop.f32.mrb[79].mxu0 }
 0x271   : > { %v1288_v28 = vpop.f32.mrb[80].mxu1 }
 0x272   : > { %v1640_v10 = vadd.f32 %v1614_v51, %v1588_v1  ;;  %v1615_v13 = vmul.f32 %v1525_v3, %v1525_v3  ;;  %v1290_v9 = vpop.f32.mrb[81].mxu1 }
 0x273   : > { %v1291_v15 = vpop.f32.mrb[82].mxu1 }
 0x274   : > { %v1662_v5 = vmax.f32 %v2783_v25, %v1640_v10  ;;  %v1696_v31 = vadd.f32 %v1695_v48, %v1640_v10  ;;  %v1641_v16 = vadd.f32 %v1615_v13, %v1589_v43  ;;  %v1293_v17 = vpop.f32.mrb[83].mxu1  ;;  %v1591_v25 = vmul.f32 %v2725_v11, %v2725_v11 }
 0x275   : > { %v1529_v18 = vpop.f32.mrb[80].mxu0  ;;  %v1594_v43 = vmul.f32 %v2731_v32, %v2731_v32 }
 0x276   : > { %v1663_v63 = vmax.f32 %v2785_v30, %v1641_v16  ;;  %v1697_v58 = vadd.f32 %v1696_v31, %v1641_v16  ;;  %v1530_v12 = vadd.f32 %v1529_v18, %v1288_v28  ;;  %v1531_v21 = vpop.f32.mrb[81].mxu0 }
 0x277   : > { %v1532_v23 = vpop.f32.mrb[82].mxu0 }
 0x278   : > { %v1616_v61 = vmul.f32 %v1530_v12, %v1530_v12  ;;  %v1533_v6 = vadd.f32 %v1532_v23, %v1291_v15  ;;  %v1534_v26 = vpop.f32.mrb[83].mxu0  ;;  %v1595_v15 = vmul.f32 %v2733_v35, %v2733_v35 }
 0x279   : > { %v1296_v27 = vpop.f32.mrb[84].mxu1  ;;  %v1596_v26 = vmul.f32 %v2735_v44, %v2735_v44 }
 0x27a   : > { %v1642_v29 = vadd.f32 %v1616_v61, %v1590_v0  ;;  %v1617_v38 = vmul.f32 %v1533_v6, %v1533_v6  ;;  %v1298_v34 = vpop.f32.mrb[85].mxu1 }
 0x27b   : > { %v1299_v36 = vpop.f32.mrb[86].mxu1 }
 0x27c   : > { %v1664_v30 = vmax.f32 %v2791_v42, %v1642_v29  ;;  %v1698_v39 = vadd.f32 %v1697_v58, %v1642_v29  ;;  %v1643_v40 = vadd.f32 %v1617_v38, %v1591_v25  ;;  %v1301_v41 = vpop.f32.mrb[87].mxu1  ;;  %v1593_v42 = vmul.f32 %v2729_v24, %v2729_v24 }
 0x27d   : > { %v1537_v19 = vpop.f32.mrb[84].mxu0  ;;  %v1597_v38 = vmul.f32 %v2737_v47, %v2737_v47 }
 0x27e   : > { %v1665_v45 = vmax.f32 %v2793_v2, %v1643_v40  ;;  %v1699_v7 = vadd.f32 %v1698_v39, %v1643_v40  ;;  %v1538_v46 = vadd.f32 %v1537_v19, %v1296_v27  ;;  %v1539_v33 = vpop.f32.mrb[85].mxu0 }
 0x27f   : > { %v1540_v49 = vpop.f32.mrb[86].mxu0 }
 0x280   : > { %v1618_v11 = vmul.f32 %v1538_v46, %v1538_v46  ;;  %v1541_v22 = vadd.f32 %v1540_v49, %v1299_v36  ;;  %v1542_v50 = vpop.f32.mrb[87].mxu0 }
 0x281   : > { %v1304_v52 = vpop.f32.mrb[88].mxu1 }
 0x282   : > { %v1644_v53 = vadd.f32 %v1618_v11, %v1592_v62  ;;  %v1619_v37 = vmul.f32 %v1541_v22, %v1541_v22  ;;  %v1306_v54 = vpop.f32.mrb[89].mxu1  ;;  %v1598_v11 = vmul.f32 %v2739_v56, %v2739_v56 }
 0x283   : > { %v1307_v48 = vpop.f32.mrb[90].mxu1 }
 0x284   : > { %v2811_v55 = vmax.f32 %v1662_v5, %v1644_v53  ;;  %v1700_v2 = vadd.f32 %v1699_v7, %v1644_v53  ;;  %v1645_v57 = vadd.f32 %v1619_v37, %v1593_v42  ;;  %v1309_v59 = vpop.f32.mrb[91].mxu1  ;;  %v1599_v42 = vmul.f32 %v2741_v60, %v2741_v60 }
 0x285   : > { %v1545_v1 = vpop.f32.mrb[88].mxu0 }
 0x286   : > { %v2813_v51 = vmax.f32 %v1663_v63, %v1645_v57  ;;  %v1701_v20 = vadd.f32 %v1700_v2, %v1645_v57  ;;  %v1546_v3 = vadd.f32 %v1545_v1, %v1304_v52  ;;  %v1547_v4 = vpop.f32.mrb[89].mxu0 }
 0x287   : > { %v1548_v28 = vpop.f32.mrb[90].mxu0 }
 0x288   : > { %v1620_v24 = vmul.f32 %v1546_v3, %v1546_v3  ;;  %v1549_v10 = vadd.f32 %v1548_v28, %v1307_v48  ;;  %v1550_v13 = vpop.f32.mrb[91].mxu0  ;;  %v1600_v28 = vmul.f32 %v2743_v8, %v2743_v8 }
 0x289   : > { %v1312_v9 = vpop.f32.mrb[92].mxu1  ;;  %v1601_v13 = vmul.f32 %v2745_v14, %v2745_v14 }
 0x28a   : > { %v1646_v5 = vadd.f32 %v1620_v24, %v1594_v43  ;;  %v1621_v31 = vmul.f32 %v1549_v10, %v1549_v10  ;;  %v1314_v16 = vpop.f32.mrb[93].mxu1 }
 0x28b   : > { %v1315_v17 = vpop.f32.mrb[94].mxu1 }
 0x28c   : > { %v1668_v18 = vmax.f32 %v1664_v30, %v1646_v5  ;;  %v1702_v63 = vadd.f32 %v1701_v20, %v1646_v5  ;;  %v1647_v58 = vadd.f32 %v1621_v31, %v1595_v15  ;;  %v1317_v12 = vpop.f32.mrb[95].mxu1 }
 0x28d   : > { %v1553_v21 = vpop.f32.mrb[92].mxu0 }
 0x28e   : > { %v1669_v23 = vmax.f32 %v1665_v45, %v1647_v58  ;;  %v1703_v0 = vadd.f32 %v1702_v63, %v1647_v58  ;;  %v1554_v61 = vadd.f32 %v1553_v21, %v1312_v9  ;;  %v1555_v32 = vpop.f32.mrb[93].mxu0 }
 0x28f   : > { %v1556_v6 = vpop.f32.mrb[94].mxu0 }
 0x290   : > { %v1622_v27 = vmul.f32 %v1554_v61, %v1554_v61  ;;  %v1557_v25 = vadd.f32 %v1556_v6, %v1315_v17  ;;  %v1558_v35 = vpop.f32.mrb[95].mxu0 }
 0x291   : > { %v1320_v29 = vpop.f32.mrb[96].mxu1 }
 0x292   : > { %v1648_v34 = vadd.f32 %v1622_v27, %v1596_v26  ;;  %v1623_v36 = vmul.f32 %v1557_v25, %v1557_v25  ;;  %v1322_v30 = vpop.f32.mrb[97].mxu1 }
 0x293   : > { %v1323_v39 = vpop.f32.mrb[98].mxu1 }
 0x294   : > { %v1670_v40 = vmax.f32 %v2811_v55, %v1648_v34  ;;  %v1704_v41 = vadd.f32 %v1703_v0, %v1648_v34  ;;  %v1649_v19 = vadd.f32 %v1623_v36, %v1597_v38  ;;  %v1325_v45 = vpop.f32.mrb[99].mxu1 }
 0x295   : > { %v1561_v7 = vpop.f32.mrb[96].mxu0 }
 0x296   : > { %v1671_v46 = vmax.f32 %v2813_v51, %v1649_v19  ;;  %v1705_v44 = vadd.f32 %v1704_v41, %v1649_v19  ;;  %v1562_v33 = vadd.f32 %v1561_v7, %v1320_v29  ;;  %v1563_v49 = vpop.f32.mrb[97].mxu0 }
 0x297   : > { %v1564_v62 = vpop.f32.mrb[98].mxu0 }
 0x298   : > { %v1624_v47 = vmul.f32 %v1562_v33, %v1562_v33  ;;  %v1565_v22 = vadd.f32 %v1564_v62, %v1323_v39  ;;  %v1566_v50 = vpop.f32.mrb[99].mxu0 }
 0x299   : > { %v1328_v52 = vpop.f32.mrb[100].mxu1 }
 0x29a   : > { %v1650_v53 = vadd.f32 %v1624_v47, %v1598_v11  ;;  %v1625_v37 = vmul.f32 %v1565_v22, %v1565_v22  ;;  %v1330_v54 = vpop.f32.mrb[101].mxu1 }
 0x29b   : > { %v1331_v48 = vpop.f32.mrb[102].mxu1 }
 0x29c   : > { %v1672_v55 = vmax.f32 %v1668_v18, %v1650_v53  ;;  %v1706_v2 = vadd.f32 %v1705_v44, %v1650_v53  ;;  %v1651_v57 = vadd.f32 %v1625_v37, %v1599_v42  ;;  %v1333_v59 = vpop.f32.mrb[103].mxu1 }
 0x29d   : > { %v1569_v1 = vpop.f32.mrb[100].mxu0 }
 0x29e   : > { %v1673_v51 = vmax.f32 %v1669_v23, %v1651_v57  ;;  %v1707_v20 = vadd.f32 %v1706_v2, %v1651_v57  ;;  %v1570_v3 = vadd.f32 %v1569_v1, %v1328_v52  ;;  %v1571_v56 = vpop.f32.mrb[101].mxu0 }
 0x29f   : > { %v1572_v4 = vpop.f32.mrb[102].mxu0 }
 0x2a0   : > { %v1677_v43 = vmax.f32 %v1672_v55, %v1673_v51  ;;  %v1626_v24 = vmul.f32 %v1570_v3, %v1570_v3  ;;  %v1573_v60 = vadd.f32 %v1572_v4, %v1331_v48  ;;  %v1574_v10 = vpop.f32.mrb[103].mxu0 }
 0x2a2   : > { %v1652_v9 = vadd.f32 %v1626_v24, %v1600_v28  ;;  %v1627_v15 = vmul.f32 %v1573_v60, %v1573_v60 }
 0x2a4   : > { %v1674_v5 = vmax.f32 %v1670_v40, %v1652_v9  ;;  %v1708_v31 = vadd.f32 %v1707_v20, %v1652_v9  ;;  %v1653_v16 = vadd.f32 %v1627_v15, %v1601_v13 }
 0x2a6   : > { %v1675_v17 = vmax.f32 %v1671_v46, %v1653_v16  ;;  %v1709_v18 = vadd.f32 %v1708_v31, %v1653_v16 }
 0x2a8   : > { %v1676_v63 = vmax.f32 %v1674_v5, %v1675_v17  ;;  %v1710_v58 = vrot.slane %v1709_v18, 4 }
 0x2aa   : > { %v1678_v12 = vmax.f32 %v1676_v63, %v1677_v43  ;;  %v1711_v8 = vadd.f32 %v1710_v58, %v1709_v18 }
 0x2ac   : > { %v1712_v21 = vrot.slane %v1711_v8, 2  ;;  %v1679_v23 = vrot.slane %v1678_v12, 4 }
 0x2ae   : > { %v1713_v0 = vadd.f32 %v1712_v21, %v1711_v8  ;;  %v1680_v32 = vmax.f32 %v1678_v12, %v1679_v23 }
 0x2b0   : > { %v1714_v61 = vrot.slane %v1713_v0, 1  ;;  %v1681_v26 = vrot.slane %v1680_v32, 2 }
 0x2b2   : > { %v1715_v6 = vadd.f32 %v1714_v61, %v1713_v0  ;;  %v1682_v25 = vmax.f32 %v1680_v32, %v1681_v26 }
 0x2b4   : > { %v1716_v14 = vmul.f32 0.0049751243, %v1715_v6  ;;  %v1683_v35 = vrot.slane %v1682_v25, 1 }
 0x2b6   : > { %v1717_v27 = vadd.f32 1e-20, %v1716_v14  ;;  %v1684_v29 = vmax.f32 %v1682_v25, %v1683_v35 }
 0x2b8   : > { %2291 = vrcp.f32 %v1717_v27 }
 0x2c2   : > { %v2292_v38 = vpop.eup %2291 }
 0x2c3   : > { %v1719_v34 = vmul.f32 %v2292_v38, %v1684_v29 }
 0x2c5   : > { %1720 = vst [vmem:[%s174_s3] sm:$0x1] %v1719_v34 }
 0x2c6   : > { %2334 = shalt.err (!%p2331_p6)
}
 0x2c7   : > { %s2335_s20 = scalar_lea.hbm %s2838_s7, 16  ;;  %s2339_s27 = scalar_lea.hbm %s2887_s2, 32 }
 0x2c8   : > { %p2336_p7 = scmp.ne.s32.totalorder %s2838_s7, %s2335_s20  ;;  %p2340_p0 = scmp.lt.u32.totalorder %s2838_s7, %s2887_s2 }
 0x2c9   : > { %p2341_p2 = scmp.lt.u32.totalorder %s2339_s27, %s2335_s20  ;;  %p2343_p8 = scmp.lt.u32.totalorder %s2335_s20, %s2838_s7 }
 0x2ca   : > { %p2337_p9 = pnand %p2336_p7, %p2899_p10 }
 0x2cb   : > { %p2342_p4 = por %p2341_p2, %p2340_p0 }
 0x2cc   : > { %p2338_p12 = pneg %p2337_p9 }
 0x2cd   : > { %p2344_p11 = por %p2343_p8, %p2342_p4 }
 0x2cf   : > { %p2345_p13 = pnand %p2344_p11, %p2338_p12 }
 0x2d1   : > { %2348 = shalt.err (!%p2345_p13)
}
 0x2d2   : > { %2038 = dma.vmem_to_hbm [thread:$0]  (%p2899_p10), %s2840_s4, 16, %s2838_s7, %s1722_s8  }
 0x2d3 PF: > { %p2050_p1 = scmp.ge.s32.totalorder %s2403_s14, 2  ;;  %s1747_s28 = sand.u32 1, %s2383_s9  }
 0x2d4   : > { %p2900_p3 = scmp.ne.s32.totalorder %s2893_s21, 0  ;;  %s1748_s29 = scalar_lea.sflag [#allocation4], %s1747_s28 }
 0x2d6   : > { %p2045_p5 = pnand %p2050_p1, %p2900_p3 }
 0x2d8   : > { %2378 = dma.done.wait (!%p2045_p5), %s1748_s29, 16  }
 0x2d9   : > { %2380 = vsyncadd (!%p2045_p5), %s1748_s29, 4294967280  ;;  %s16_s14 = sadd.s32 1, %s2403_s14   ;;  %s2901_s9 = smov %s2387_s10 }
 0x2da   : > { %p13_p6 = scmp.ge.s32.totalorder %s16_s14, 4   ;;  %s2902_s10 = smov %s2391_s11 }
 0x2db   : > { %s2903_s11 = smov %s2480_s22  ;;  %s2904_s12 = smov %s2399_s13 }
 0x2dc   : > { %s2905_s13 = smov %s2907_s17  ;;  %15 = sbr.rel (!%p13_p6) target bundleno = 5 (0x5), region = 68 }
 0x2e3   :  { %1752 = vsyncpa [#allocation3], 1 }
 0x2e4   :  { %1754 = vsyncpa [#allocation3 + $0x1], 1 }
 0x2e5   :  { %1755 = vsyncpa [#allocation4], 1 }
 0x2e6   :  { %1757 = vsyncpa [#allocation4 + $0x1], 1 }

</bundles_post_ra>
